<compile_context>
chip_gen: v5e
topology: v5e:2x2
jax: 0.10.0
libtpu: 0.0.40
codegen_flags: <defaults>
</compile_context>

<pallas_src>
import math
import functools

import jax
import jax.numpy as jnp
from jax import lax
from jax.experimental import pallas as pl
from jax.experimental.pallas import tpu as pltpu


def _softplus(x):
    # matches F.softplus (threshold=20), lowers cleanly
    return jnp.where(x > 20.0, x, jnp.log1p(jnp.exp(jnp.minimum(x, 20.0))))


def _silu(x):
    return x * jax.nn.sigmoid(x)


def _fused_mamba_kernel(
    # inputs --------------------------------------------------------------
    x_ref,                    # (L*B, D)   time-major rows: row = t*B + b
    ln_g_ref, ln_b_ref,       # (1, 1, D)
    in_w_ref, in_b_ref,       # (1, D, 2*di), (1, 1, 2*di)
    conv_w_ref, conv_b_ref,   # (1, K, di),  (1, 1, di)
    xdt_w_ref, xdt_b_ref,     # (1, di, di+2*ds), (1, 1, di+2*ds)  (dt_proj folded in)
    negA_ref,                 # (1, ds, di)   = -exp(A_log)^T
    dskip_ref,                # (1, 1, di)
    out_w_ref, out_b_ref,     # (1, di, D), (1, 1, D)
    scale_ref,                # (1, 1, D)
    # outputs -------------------------------------------------------------
    o_ref,                    # (L*B, D)
    # scratch (persists across the layer grid) -----------------------------
    act_ref,                  # (L*B, D)           carried residual stream
    convpad_ref,              # (pad_rows + L*B, di)
    dt_ref, dtx_ref,          # (L*B, di)
    b_ref, c_ref,             # (L*B, ds)
    y_ref,                    # (L*B, di)
    *, batch, seqlen, d_inner, d_state, d_conv, pad_rows, eps,
):
    layer = pl.program_id(0)
    LB = batch * seqlen

    # layer 0: pull the input into the persistent activation scratch
    @pl.when(layer == 0)
    def _():
        act_ref[...] = x_ref[...]

    x_res = act_ref[...]                                   # (LB, D)
    mm_dtype = in_w_ref.dtype

    # ---- LayerNorm -------------------------------------------------------
    mean = jnp.mean(x_res, axis=-1, keepdims=True)
    var = jnp.mean((x_res - mean) ** 2, axis=-1, keepdims=True)
    xn = (x_res - mean) * lax.rsqrt(var + eps)
    xn = xn * ln_g_ref[0] + ln_b_ref[0]

    # ---- in_proj: one (B*L, D) x (D, 2*di) matmul for the whole batch ----
    xz = jnp.dot(xn.astype(mm_dtype), in_w_ref[0],
                 preferred_element_type=jnp.float32) + in_b_ref[0]
    xs = xz[:, :d_inner]                                   # (LB, di)
    z = xz[:, d_inner:]                                    # (LB, di)

    # ---- depthwise causal conv1d -----------------------------------------
    # time-major rows => shift by s timesteps == shift by s*batch rows;
    # the zero-padded scratch supplies the causal zeros (no concat/retile).
    if pad_rows:
        convpad_ref[0:pad_rows, :] = jnp.zeros((pad_rows, d_inner), jnp.float32)
    convpad_ref[pad_rows:pad_rows + LB, :] = xs
    conv_w = conv_w_ref[0]                                 # (K, di)
    acc = conv_w[d_conv - 1:d_conv, :] * xs                # shift-0 term
    for k in range(d_conv - 1):                            # K is tiny & static
        shift = (d_conv - 1 - k) * batch
        acc = acc + conv_w[k:k + 1, :] * convpad_ref[
            pad_rows - shift: pad_rows - shift + LB, :]
    xc = _silu(acc + conv_b_ref[0])                        # (LB, di)

    # ---- x_proj with dt_proj folded in ------------------------------------
    xdbl = jnp.dot(xc.astype(mm_dtype), xdt_w_ref[0],
                   preferred_element_type=jnp.float32) + xdt_b_ref[0]
    dt = _softplus(xdbl[:, :d_inner])                      # (LB, di)
    dt_ref[...] = dt
    dtx_ref[...] = dt * xc                                 # precompute dt*xc once
    b_ref[...] = xdbl[:, d_inner:d_inner + d_state]        # (LB, ds)
    c_ref[...] = xdbl[:, d_inner + d_state:]               # (LB, ds)

    negA = negA_ref[0]                                     # (ds, di)

    # ---- selective scan: sequential over time, vectorised over batch ------
    def scan_body(t, h):                                   # h: (B, ds, di)
        rows = pl.ds(t * batch, batch)
        dt_t = dt_ref[rows, :]                             # (B, di)
        dtx_t = dtx_ref[rows, :]                           # (B, di)
        b_t = b_ref[rows, :]                               # (B, ds)
        c_t = c_ref[rows, :]                               # (B, ds)
        dA = jnp.exp(dt_t[:, None, :] * negA)              # (B, ds, di)
        dBx = b_t[:, :, None] * dtx_t[:, None, :]          # (B, ds, di)
        h = dA * h + dBx
        y_ref[rows, :] = jnp.sum(c_t[:, :, None] * h, axis=1)   # (B, di)
        return h

    h0 = jnp.zeros((batch, d_state, d_inner), jnp.float32)
    _ = lax.fori_loop(0, seqlen, scan_body, h0, unroll=True)

    # ---- skip, gate, out_proj, residual + layer scale ----------------------
    y = y_ref[...] + dskip_ref[0] * xc
    y = y * _silu(z)
    out = jnp.dot(y.astype(mm_dtype), out_w_ref[0],
                  preferred_element_type=jnp.float32) + out_b_ref[0]

    # Dropout = identity in eval mode.
    new_act = x_res + scale_ref[0] * out
    act_ref[...] = new_act
    o_ref[...] = new_act


def mamba_layer_forward(x, layer_params, *, d_state, d_conv, expand,
                        eps=1e-5, matmul_dtype=jnp.float32):
    """MambaLayer forward: all layers + batch fused into a single pallas_call."""
    B, L, D = x.shape
    d_inner = expand * D
    dt_rank = math.ceil(D / 16)
    NL = len(layer_params)
    LB = L * B
    pad_rows = ((d_conv - 1) * B + 7) // 8 * 8
    f32 = jnp.float32

    def stack(name):
        return jnp.stack([p[name] for p in layer_params])

    # per-layer vectors -> (NL, 1, X); matrices -> (NL, A, X)
    ln_g = stack('ln_g')[:, None, :]
    ln_b = stack('ln_b')[:, None, :]
    in_w = stack('in_w').astype(matmul_dtype)
    in_b = stack('in_b')[:, None, :]
    conv_w = stack('conv_w')
    conv_b = stack('conv_b')[:, None, :]
    # fold dt_proj into x_proj:  xc @ [xp[:, :r] @ dt_w | xp[:, r:]] + [dt_b | 0]
    xdt_w = jnp.stack([
        jnp.concatenate([p['xproj_w'][:, :dt_rank] @ p['dt_w'],
                         p['xproj_w'][:, dt_rank:]], axis=1)
        for p in layer_params]).astype(matmul_dtype)
    xdt_b = jnp.stack([
        jnp.concatenate([p['dt_b'], jnp.zeros((2 * d_state,), f32)])
        for p in layer_params])[:, None, :]
    negA = jnp.stack([-jnp.exp(p['A_logT']) for p in layer_params])
    dskip = stack('D')[:, None, :]
    out_w = stack('out_w').astype(matmul_dtype)
    out_b = stack('out_b')[:, None, :]
    scale = stack('scale')[:, None, :]

    weights = (ln_g, ln_b, in_w, in_b, conv_w, conv_b, xdt_w, xdt_b,
               negA, dskip, out_w, out_b, scale)

    def wspec(arr):
        return pl.BlockSpec((1,) + arr.shape[1:], lambda l: (l, 0, 0))

    kernel = functools.partial(
        _fused_mamba_kernel,
        batch=B, seqlen=L, d_inner=d_inner, d_state=d_state,
        d_conv=d_conv, pad_rows=pad_rows, eps=eps)

    # time-major rows (row = t*B + b)
    x_tm = jnp.transpose(x, (1, 0, 2)).reshape(LB, D)

    out_tm = pl.pallas_call(
        kernel,
        out_shape=jax.ShapeDtypeStruct((LB, D), f32),
        grid_spec=pltpu.PrefetchScalarGridSpec(
            num_scalar_prefetch=0,
            grid=(NL,),
            in_specs=[pl.BlockSpec((LB, D), lambda l: (0, 0))] +
                     [wspec(w) for w in weights],
            out_specs=pl.BlockSpec((LB, D), lambda l: (0, 0)),
            scratch_shapes=[
                pltpu.VMEM((LB, D), f32),                    # carried activation
                pltpu.VMEM((pad_rows + LB, d_inner), f32),   # causal-conv pad buffer
                pltpu.VMEM((LB, d_inner), f32),              # dt
                pltpu.VMEM((LB, d_inner), f32),              # dt * xc
                pltpu.VMEM((LB, d_state), f32),              # B
                pltpu.VMEM((LB, d_state), f32),              # C
                pltpu.VMEM((LB, d_inner), f32),              # y (scan output rows)
            ]),
        compiler_params=pltpu.CompilerParams(
            dimension_semantics=("arbitrary",)),             # layers are sequential
    )(x_tm, *weights)

    return out_tm.reshape(L, B, D).transpose(1, 0, 2)


def make_params(key, num_layers, d_model, d_state, d_conv, expand):
    """Random parameters mirroring MambaLayer's state dict (eval mode)."""
    d_inner = expand * d_model
    dt_rank = math.ceil(d_model / 16)
    layers = []
    for i in range(num_layers):
        ks = jax.random.split(jax.random.fold_in(key, i), 8)
        # mamba A_log init: A[i, s] = s + 1, stored transposed as (ds, di)
        A_logT = jnp.log(jnp.broadcast_to(
            jnp.arange(1, d_state + 1, dtype=jnp.float32)[:, None],
            (d_state, d_inner)))
        layers.append(dict(
            ln_g=jnp.ones((d_model,), jnp.float32),
            ln_b=jnp.zeros((d_model,), jnp.float32),
            in_w=0.15 * jax.random.normal(ks[0], (d_model, 2 * d_inner), jnp.float32),
            in_b=jnp.zeros((2 * d_inner,), jnp.float32),
            conv_w=0.2 * jax.random.normal(ks[1], (d_conv, d_inner), jnp.float32),
            conv_b=0.1 * jax.random.normal(ks[2], (d_inner,), jnp.float32),
            xproj_w=0.1 * jax.random.normal(ks[3], (d_inner, dt_rank + 2 * d_state), jnp.float32),
            dt_w=0.2 * jax.random.normal(ks[4], (dt_rank, d_inner), jnp.float32),
            dt_b=0.2 * jax.random.normal(ks[5], (d_inner,), jnp.float32),
            A_logT=A_logT,
            D=jnp.ones((d_inner,), jnp.float32),
            out_w=0.1 * jax.random.normal(ks[6], (d_inner, d_model), jnp.float32),
            out_b=jnp.zeros((d_model,), jnp.float32),
            scale=jnp.full((d_model,), 0.1, jnp.float32),
        ))
    return layers


def mamba_layer_reference(x, layer_params, *, d_state, d_conv, expand, eps=1e-5):
    """Straightforward pure-JAX reference mirroring the PyTorch module (eval)."""
    B, L, D = x.shape
    d_inner = expand * D
    dt_rank = math.ceil(D / 16)
    for p in layer_params:
        res = x
        mu = jnp.mean(x, axis=-1, keepdims=True)
        var = jnp.mean((x - mu) ** 2, axis=-1, keepdims=True)
        xn = (x - mu) / jnp.sqrt(var + eps) * p['ln_g'] + p['ln_b']
        xz = xn @ p['in_w'] + p['in_b']
        xs, z = xz[..., :d_inner], xz[..., d_inner:]
        xp = jnp.pad(xs, ((0, 0), (d_conv - 1, 0), (0, 0)))
        xc = p['conv_b'] + sum(p['conv_w'][k] * xp[:, k:k + L, :]
                               for k in range(d_conv))
        xc = xc * jax.nn.sigmoid(xc)
        x_dbl = xc @ p['xproj_w']
        dt = jax.nn.softplus(x_dbl[..., :dt_rank] @ p['dt_w'] + p['dt_b'])
        Bm = x_dbl[..., dt_rank:dt_rank + d_state]
        Cm = x_dbl[..., dt_rank + d_state:]
        A_T = -jnp.exp(p['A_logT'])                            # (ds, di)
        dA = jnp.exp(dt[:, :, None, :] * A_T[None, None])      # (B, L, ds, di)
        dBx = Bm[..., None] * (dt * xc)[:, :, None, :]         # (B, L, ds, di)
        h = jnp.zeros((B, d_state, d_inner), jnp.float32)
        ys = []
        for t in range(L):
            h = dA[:, t] * h + dBx[:, t]
            ys.append(jnp.einsum('bs,bsi->bi', Cm[:, t], h))
        y = jnp.stack(ys, axis=1) + p['D'] * xc
        y = y * (z * jax.nn.sigmoid(z))
        x = res + p['scale'] * (y @ p['out_w'] + p['out_b'])
    return x


if __name__ == "__main__":
    # config consistent with the module: mamba.hidden_dim=32, d_state=8,
    # d_conv=4, expand=2, num_layers=2, norm_eps=1e-5, dropout (eval) = identity
    B, L, D = 2, 8, 32
    d_state, d_conv, expand, num_layers = 8, 4, 2, 2

    key = jax.random.PRNGKey(0)
    kx, kp = jax.random.split(key)
    x = jax.random.normal(kx, (B, L, D), jnp.float32)
    params = make_params(kp, num_layers, D, d_state, d_conv, expand)

    fwd = jax.jit(functools.partial(
        mamba_layer_forward, d_state=d_state, d_conv=d_conv, expand=expand))
    out = jax.block_until_ready(fwd(x, params))

    assert out.shape == (B, L, D)
    assert bool(jnp.all(jnp.isfinite(out)))

    # pure-JAX reference check (f32 matmul path)
    ref = mamba_layer_reference(x, params, d_state=d_state, d_conv=d_conv,
                                expand=expand)
    err = float(jnp.max(jnp.abs(out - ref)))
    assert err < 2e-3, f"kernel/reference mismatch: max abs err = {err}"

    print("KERNEL_OK")
</pallas_src>

<mosaic_0001>
module attributes {stable_mosaic.version = 11 : i64} {
  func.func @_fused_mamba_kernel(%arg0: i32, %arg1: memref<16x32xf32, #tpu.memory_space<vmem>>, %arg2: memref<1x1x32xf32, #tpu.memory_space<vmem>>, %arg3: memref<1x1x32xf32, #tpu.memory_space<vmem>>, %arg4: memref<1x32x128xf32, #tpu.memory_space<vmem>>, %arg5: memref<1x1x128xf32, #tpu.memory_space<vmem>>, %arg6: memref<1x4x64xf32, #tpu.memory_space<vmem>>, %arg7: memref<1x1x64xf32, #tpu.memory_space<vmem>>, %arg8: memref<1x64x80xf32, #tpu.memory_space<vmem>>, %arg9: memref<1x1x80xf32, #tpu.memory_space<vmem>>, %arg10: memref<1x8x64xf32, #tpu.memory_space<vmem>>, %arg11: memref<1x1x64xf32, #tpu.memory_space<vmem>>, %arg12: memref<1x64x32xf32, #tpu.memory_space<vmem>>, %arg13: memref<1x1x32xf32, #tpu.memory_space<vmem>>, %arg14: memref<1x1x32xf32, #tpu.memory_space<vmem>>, %arg15: memref<16x32xf32, #tpu.memory_space<vmem>>, %arg16: memref<16x32xf32, #tpu.memory_space<vmem>>, %arg17: memref<24x64xf32, #tpu.memory_space<vmem>>, %arg18: memref<16x64xf32, #tpu.memory_space<vmem>>, %arg19: memref<16x64xf32, #tpu.memory_space<vmem>>, %arg20: memref<16x8xf32, #tpu.memory_space<vmem>>, %arg21: memref<16x8xf32, #tpu.memory_space<vmem>>, %arg22: memref<16x64xf32, #tpu.memory_space<vmem>>) attributes {dimension_semantics = [#tpu.dimension_semantics<arbitrary>], iteration_bounds = array<i64: 2>, scalar_prefetch = 0 : i64, scratch_operands = 7 : i64, tpu.core_type = #tpu.core_type<tc>, window_params = [{pipeline_mode = #tpu.pipeline_mode<synchronous>, transform_indices = @transform_0, window_bounds = array<i64: 16, 32>}, {transform_indices = @transform_1, window_bounds = array<i64: 1, 1, 32>}, {transform_indices = @transform_2, window_bounds = array<i64: 1, 1, 32>}, {transform_indices = @transform_3, window_bounds = array<i64: 1, 32, 128>}, {transform_indices = @transform_4, window_bounds = array<i64: 1, 1, 128>}, {transform_indices = @transform_5, window_bounds = array<i64: 1, 4, 64>}, {transform_indices = @transform_6, window_bounds = array<i64: 1, 1, 64>}, {transform_indices = @transform_7, window_bounds = array<i64: 1, 64, 80>}, {transform_indices = @transform_8, window_bounds = array<i64: 1, 1, 80>}, {transform_indices = @transform_9, window_bounds = array<i64: 1, 8, 64>}, {transform_indices = @transform_10, window_bounds = array<i64: 1, 1, 64>}, {transform_indices = @transform_11, window_bounds = array<i64: 1, 64, 32>}, {transform_indices = @transform_12, window_bounds = array<i64: 1, 1, 32>}, {transform_indices = @transform_13, window_bounds = array<i64: 1, 1, 32>}, {pipeline_mode = #tpu.pipeline_mode<synchronous>, transform_indices = @transform_14, window_bounds = array<i64: 16, 32>}]} {
    %c0_i32 = arith.constant 0 : i32
    %0 = arith.cmpi eq, %arg0, %c0_i32 : i32
    %1 = arith.extui %0 : i1 to i32
    %c0_i32_0 = arith.constant 0 : i32
    %2 = arith.cmpi ne, %1, %c0_i32_0 : i32
    scf.if %2 {
      %c0_131 = arith.constant 0 : index
      %c0_132 = arith.constant 0 : index
      %348 = vector.load %arg1[%c0_131, %c0_132] : memref<16x32xf32, #tpu.memory_space<vmem>>, vector<16x32xf32>
      %c0_133 = arith.constant 0 : index
      %c0_134 = arith.constant 0 : index
      %349 = vector.load %arg16[%c0_133, %c0_134] : memref<16x32xf32, #tpu.memory_space<vmem>>, vector<16x32xf32>
      tpu.vector_store %arg16[%c0_133, %c0_134], %348 {strides = array<i32>} : memref<16x32xf32, #tpu.memory_space<vmem>>, vector<16x32xf32>,
    } else {
    }
    %c0 = arith.constant 0 : index
    %c0_1 = arith.constant 0 : index
    %3 = vector.load %arg16[%c0, %c0_1] : memref<16x32xf32, #tpu.memory_space<vmem>>, vector<16x32xf32>
    %cst = arith.constant dense<0.000000e+00> : vector<16xf32>
    %4 = vector.multi_reduction <add>, %3, %cst [1] : vector<16x32xf32> to vector<16xf32>
    %5 = vector.shape_cast %4 : vector<16xf32> to vector<16x1xf32>
    %cst_2 = arith.constant 3.200000e+01 : f32
    %6 = vector.broadcast %cst_2 : f32 to vector<16x1xf32>
    %7 = arith.divf %5, %6 : vector<16x1xf32>
    %8 = vector.broadcast %7 : vector<16x1xf32> to vector<16x32xf32>
    %9 = arith.subf %3, %8 : vector<16x32xf32>
    %10 = arith.mulf %9, %9 : vector<16x32xf32>
    %cst_3 = arith.constant dense<0.000000e+00> : vector<16xf32>
    %11 = vector.multi_reduction <add>, %10, %cst_3 [1] : vector<16x32xf32> to vector<16xf32>
    %12 = vector.shape_cast %11 : vector<16xf32> to vector<16x1xf32>
    %cst_4 = arith.constant 3.200000e+01 : f32
    %13 = vector.broadcast %cst_4 : f32 to vector<16x1xf32>
    %14 = arith.divf %12, %13 : vector<16x1xf32>
    %15 = vector.broadcast %7 : vector<16x1xf32> to vector<16x32xf32>
    %16 = arith.subf %3, %15 : vector<16x32xf32>
    %cst_5 = arith.constant 9.99999974E-6 : f32
    %17 = vector.broadcast %cst_5 : f32 to vector<16x1xf32>
    %18 = arith.addf %14, %17 : vector<16x1xf32>
    %19 = math.rsqrt %18 : vector<16x1xf32>
    %20 = vector.broadcast %19 : vector<16x1xf32> to vector<16x32xf32>
    %21 = arith.mulf %16, %20 : vector<16x32xf32>
    %c0_6 = arith.constant 0 : index
    %c0_7 = arith.constant 0 : index
    %c0_8 = arith.constant 0 : index
    %22 = vector.load %arg2[%c0_6, %c0_7, %c0_8] : memref<1x1x32xf32, #tpu.memory_space<vmem>>, vector<1x1x32xf32>
    %23 = vector.shape_cast %22 : vector<1x1x32xf32> to vector<1x32xf32>
    %24 = vector.broadcast %23 : vector<1x32xf32> to vector<16x32xf32>
    %25 = arith.mulf %21, %24 : vector<16x32xf32>
    %c0_9 = arith.constant 0 : index
    %c0_10 = arith.constant 0 : index
    %c0_11 = arith.constant 0 : index
    %26 = vector.load %arg3[%c0_9, %c0_10, %c0_11] : memref<1x1x32xf32, #tpu.memory_space<vmem>>, vector<1x1x32xf32>
    %27 = vector.shape_cast %26 : vector<1x1x32xf32> to vector<1x32xf32>
    %28 = vector.broadcast %27 : vector<1x32xf32> to vector<16x32xf32>
    %29 = arith.addf %25, %28 : vector<16x32xf32>
    %c0_12 = arith.constant 0 : index
    %c0_13 = arith.constant 0 : index
    %c0_14 = arith.constant 0 : index
    %30 = vector.load %arg4[%c0_12, %c0_13, %c0_14] : memref<1x32x128xf32, #tpu.memory_space<vmem>>, vector<1x32x128xf32>
    %31 = vector.shape_cast %30 : vector<1x32x128xf32> to vector<32x128xf32>
    %cst_15 = arith.constant dense<0.000000e+00> : vector<16x128xf32>
    %32 = tpu.matmul %29, %31, %cst_15 {dimension_numbers = #tpu.dot_dimension_numbers<[1], [0], [0], [1], [0, 0, 1, 1], [], []>} : vector<16x32xf32>, vector<32x128xf32>, vector<16x128xf32> -> vector<16x128xf32>
    %c0_16 = arith.constant 0 : index
    %c0_17 = arith.constant 0 : index
    %c0_18 = arith.constant 0 : index
    %33 = vector.load %arg5[%c0_16, %c0_17, %c0_18] : memref<1x1x128xf32, #tpu.memory_space<vmem>>, vector<1x1x128xf32>
    %34 = vector.shape_cast %33 : vector<1x1x128xf32> to vector<1x128xf32>
    %35 = vector.broadcast %34 : vector<1x128xf32> to vector<16x128xf32>
    %36 = arith.addf %32, %35 : vector<16x128xf32>
    %37 = vector.extract_strided_slice %36 {offsets = [0, 0], sizes = [16, 64], strides = [1, 1]} : vector<16x128xf32> to vector<16x64xf32>
    %38 = vector.extract_strided_slice %36 {offsets = [0, 64], sizes = [16, 64], strides = [1, 1]} : vector<16x128xf32> to vector<16x64xf32>
    %cst_19 = arith.constant 0.000000e+00 : f32
    %39 = vector.broadcast %cst_19 : f32 to vector<8x64xf32>
    %c0_20 = arith.constant 0 : index
    %c0_21 = arith.constant 0 : index
    %40 = vector.load %arg17[%c0_20, %c0_21] : memref<24x64xf32, #tpu.memory_space<vmem>>, vector<8x64xf32>
    tpu.vector_store %arg17[%c0_20, %c0_21], %39 {strides = array<i32>} : memref<24x64xf32, #tpu.memory_space<vmem>>, vector<8x64xf32>,
    %c8 = arith.constant 8 : index
    %c0_22 = arith.constant 0 : index
    %41 = vector.load %arg17[%c8, %c0_22] : memref<24x64xf32, #tpu.memory_space<vmem>>, vector<16x64xf32>
    tpu.vector_store %arg17[%c8, %c0_22], %37 {strides = array<i32>} : memref<24x64xf32, #tpu.memory_space<vmem>>, vector<16x64xf32>,
    %c0_23 = arith.constant 0 : index
    %c0_24 = arith.constant 0 : index
    %c0_25 = arith.constant 0 : index
    %42 = vector.load %arg6[%c0_23, %c0_24, %c0_25] : memref<1x4x64xf32, #tpu.memory_space<vmem>>, vector<1x4x64xf32>
    %43 = vector.shape_cast %42 : vector<1x4x64xf32> to vector<4x64xf32>
    %44 = vector.extract_strided_slice %43 {offsets = [3, 0], sizes = [1, 64], strides = [1, 1]} : vector<4x64xf32> to vector<1x64xf32>
    %45 = vector.broadcast %44 : vector<1x64xf32> to vector<16x64xf32>
    %46 = arith.mulf %45, %37 : vector<16x64xf32>
    %47 = vector.extract_strided_slice %43 {offsets = [0, 0], sizes = [1, 64], strides = [1, 1]} : vector<4x64xf32> to vector<1x64xf32>
    %c2 = arith.constant 2 : index
    %c0_26 = arith.constant 0 : index
    %48 = vector.load %arg17[%c2, %c0_26] : memref<24x64xf32, #tpu.memory_space<vmem>>, vector<16x64xf32>
    %49 = vector.broadcast %47 : vector<1x64xf32> to vector<16x64xf32>
    %50 = arith.mulf %49, %48 : vector<16x64xf32>
    %51 = arith.addf %46, %50 : vector<16x64xf32>
    %52 = vector.extract_strided_slice %43 {offsets = [1, 0], sizes = [1, 64], strides = [1, 1]} : vector<4x64xf32> to vector<1x64xf32>
    %c4 = arith.constant 4 : index
    %c0_27 = arith.constant 0 : index
    %53 = vector.load %arg17[%c4, %c0_27] : memref<24x64xf32, #tpu.memory_space<vmem>>, vector<16x64xf32>
    %54 = vector.broadcast %52 : vector<1x64xf32> to vector<16x64xf32>
    %55 = arith.mulf %54, %53 : vector<16x64xf32>
    %56 = arith.addf %51, %55 : vector<16x64xf32>
    %57 = vector.extract_strided_slice %43 {offsets = [2, 0], sizes = [1, 64], strides = [1, 1]} : vector<4x64xf32> to vector<1x64xf32>
    %c6 = arith.constant 6 : index
    %c0_28 = arith.constant 0 : index
    %58 = vector.load %arg17[%c6, %c0_28] : memref<24x64xf32, #tpu.memory_space<vmem>>, vector<16x64xf32>
    %59 = vector.broadcast %57 : vector<1x64xf32> to vector<16x64xf32>
    %60 = arith.mulf %59, %58 : vector<16x64xf32>
    %61 = arith.addf %56, %60 : vector<16x64xf32>
    %c0_29 = arith.constant 0 : index
    %c0_30 = arith.constant 0 : index
    %c0_31 = arith.constant 0 : index
    %62 = vector.load %arg7[%c0_29, %c0_30, %c0_31] : memref<1x1x64xf32, #tpu.memory_space<vmem>>, vector<1x1x64xf32>
    %63 = vector.shape_cast %62 : vector<1x1x64xf32> to vector<1x64xf32>
    %64 = vector.broadcast %63 : vector<1x64xf32> to vector<16x64xf32>
    %65 = arith.addf %61, %64 : vector<16x64xf32>
    %66 = arith.negf %65 : vector<16x64xf32>
    %67 = math.exp %66 : vector<16x64xf32>
    %cst_32 = arith.constant 1.000000e+00 : f32
    %68 = vector.broadcast %cst_32 : f32 to vector<16x64xf32>
    %69 = arith.addf %68, %67 : vector<16x64xf32>
    %70 = arith.divf %68, %69 : vector<16x64xf32>
    %71 = arith.mulf %65, %70 : vector<16x64xf32>
    %c0_33 = arith.constant 0 : index
    %c0_34 = arith.constant 0 : index
    %c0_35 = arith.constant 0 : index
    %72 = vector.load %arg8[%c0_33, %c0_34, %c0_35] : memref<1x64x80xf32, #tpu.memory_space<vmem>>, vector<1x64x80xf32>
    %73 = vector.shape_cast %72 : vector<1x64x80xf32> to vector<64x80xf32>
    %cst_36 = arith.constant dense<0.000000e+00> : vector<16x80xf32>
    %74 = tpu.matmul %71, %73, %cst_36 {dimension_numbers = #tpu.dot_dimension_numbers<[1], [0], [0], [1], [0, 0, 1, 1], [], []>} : vector<16x64xf32>, vector<64x80xf32>, vector<16x80xf32> -> vector<16x80xf32>
    %c0_37 = arith.constant 0 : index
    %c0_38 = arith.constant 0 : index
    %c0_39 = arith.constant 0 : index
    %75 = vector.load %arg9[%c0_37, %c0_38, %c0_39] : memref<1x1x80xf32, #tpu.memory_space<vmem>>, vector<1x1x80xf32>
    %76 = vector.shape_cast %75 : vector<1x1x80xf32> to vector<1x80xf32>
    %77 = vector.broadcast %76 : vector<1x80xf32> to vector<16x80xf32>
    %78 = arith.addf %74, %77 : vector<16x80xf32>
    %79 = vector.extract_strided_slice %78 {offsets = [0, 0], sizes = [16, 64], strides = [1, 1]} : vector<16x80xf32> to vector<16x64xf32>
    %cst_40 = arith.constant 2.000000e+01 : f32
    %80 = vector.broadcast %cst_40 : f32 to vector<16x64xf32>
    %81 = arith.cmpf ogt, %79, %80 : vector<16x64xf32>
    %cst_41 = arith.constant 2.000000e+01 : f32
    %82 = vector.broadcast %cst_41 : f32 to vector<16x64xf32>
    %83 = arith.minimumf %79, %82 : vector<16x64xf32>
    %84 = math.exp %83 : vector<16x64xf32>
    %85 = math.log1p %84 : vector<16x64xf32>
    %86 = arith.select %81, %79, %85 : vector<16x64xi1>, vector<16x64xf32>
    %c0_42 = arith.constant 0 : index
    %c0_43 = arith.constant 0 : index
    %87 = vector.load %arg18[%c0_42, %c0_43] : memref<16x64xf32, #tpu.memory_space<vmem>>, vector<16x64xf32>
    tpu.vector_store %arg18[%c0_42, %c0_43], %86 {strides = array<i32>} : memref<16x64xf32, #tpu.memory_space<vmem>>, vector<16x64xf32>,
    %88 = arith.mulf %86, %71 : vector<16x64xf32>
    %c0_44 = arith.constant 0 : index
    %c0_45 = arith.constant 0 : index
    %89 = vector.load %arg19[%c0_44, %c0_45] : memref<16x64xf32, #tpu.memory_space<vmem>>, vector<16x64xf32>
    tpu.vector_store %arg19[%c0_44, %c0_45], %88 {strides = array<i32>} : memref<16x64xf32, #tpu.memory_space<vmem>>, vector<16x64xf32>,
    %90 = vector.extract_strided_slice %78 {offsets = [0, 64], sizes = [16, 8], strides = [1, 1]} : vector<16x80xf32> to vector<16x8xf32>
    %c0_46 = arith.constant 0 : index
    %c0_47 = arith.constant 0 : index
    %91 = vector.load %arg20[%c0_46, %c0_47] : memref<16x8xf32, #tpu.memory_space<vmem>>, vector<16x8xf32>
    tpu.vector_store %arg20[%c0_46, %c0_47], %90 {strides = array<i32>} : memref<16x8xf32, #tpu.memory_space<vmem>>, vector<16x8xf32>,
    %92 = vector.extract_strided_slice %78 {offsets = [0, 72], sizes = [16, 8], strides = [1, 1]} : vector<16x80xf32> to vector<16x8xf32>
    %c0_48 = arith.constant 0 : index
    %c0_49 = arith.constant 0 : index
    %93 = vector.load %arg21[%c0_48, %c0_49] : memref<16x8xf32, #tpu.memory_space<vmem>>, vector<16x8xf32>
    tpu.vector_store %arg21[%c0_48, %c0_49], %92 {strides = array<i32>} : memref<16x8xf32, #tpu.memory_space<vmem>>, vector<16x8xf32>,
    %c0_50 = arith.constant 0 : index
    %c0_51 = arith.constant 0 : index
    %c0_52 = arith.constant 0 : index
    %94 = vector.load %arg10[%c0_50, %c0_51, %c0_52] : memref<1x8x64xf32, #tpu.memory_space<vmem>>, vector<1x8x64xf32>
    %95 = vector.shape_cast %94 : vector<1x8x64xf32> to vector<8x64xf32>
    %cst_53 = arith.constant 0.000000e+00 : f32
    %96 = vector.broadcast %cst_53 : f32 to vector<2x8x64xf32>
    %c0_i32_54 = arith.constant 0 : i32
    %c2_i32 = arith.constant 2 : i32
    %97 = arith.muli %c0_i32_54, %c2_i32 : i32
    %98 = arith.index_cast %97 : i32 to index
    %c0_55 = arith.constant 0 : index
    %99 = vector.load %arg18[%98, %c0_55] : memref<16x64xf32, #tpu.memory_space<vmem>>, vector<2x64xf32>
    %100 = arith.index_cast %97 : i32 to index
    %c0_56 = arith.constant 0 : index
    %101 = vector.load %arg19[%100, %c0_56] : memref<16x64xf32, #tpu.memory_space<vmem>>, vector<2x64xf32>
    %102 = arith.index_cast %97 : i32 to index
    %c0_57 = arith.constant 0 : index
    %103 = vector.load %arg20[%102, %c0_57] : memref<16x8xf32, #tpu.memory_space<vmem>>, vector<2x8xf32>
    %104 = arith.index_cast %97 : i32 to index
    %c0_58 = arith.constant 0 : index
    %105 = vector.load %arg21[%104, %c0_58] : memref<16x8xf32, #tpu.memory_space<vmem>>, vector<2x8xf32>
    %106 = vector.shape_cast %99 : vector<2x64xf32> to vector<2x1x64xf32>
    %107 = vector.shape_cast %95 : vector<8x64xf32> to vector<1x8x64xf32>
    %108 = vector.broadcast %106 : vector<2x1x64xf32> to vector<2x8x64xf32>
    %109 = vector.broadcast %107 : vector<1x8x64xf32> to vector<2x8x64xf32>
    %110 = arith.mulf %108, %109 : vector<2x8x64xf32>
    %111 = math.exp %110 : vector<2x8x64xf32>
    %112 = vector.shape_cast %103 : vector<2x8xf32> to vector<2x8x1xf32>
    %113 = vector.shape_cast %101 : vector<2x64xf32> to vector<2x1x64xf32>
    %114 = vector.broadcast %112 : vector<2x8x1xf32> to vector<2x8x64xf32>
    %115 = vector.broadcast %113 : vector<2x1x64xf32> to vector<2x8x64xf32>
    %116 = arith.mulf %114, %115 : vector<2x8x64xf32>
    %117 = arith.mulf %111, %96 : vector<2x8x64xf32>
    %118 = arith.addf %117, %116 : vector<2x8x64xf32>
    %119 = vector.shape_cast %105 : vector<2x8xf32> to vector<2x8x1xf32>
    %120 = vector.broadcast %119 : vector<2x8x1xf32> to vector<2x8x64xf32>
    %121 = arith.mulf %120, %118 : vector<2x8x64xf32>
    %cst_59 = arith.constant dense<0.000000e+00> : vector<2x64xf32>
    %122 = vector.multi_reduction <add>, %121, %cst_59 [1] : vector<2x8x64xf32> to vector<2x64xf32>
    %123 = arith.index_cast %97 : i32 to index
    %c0_60 = arith.constant 0 : index
    %124 = vector.load %arg22[%123, %c0_60] : memref<16x64xf32, #tpu.memory_space<vmem>>, vector<2x64xf32>
    tpu.vector_store %arg22[%123, %c0_60], %122 {strides = array<i32>} : memref<16x64xf32, #tpu.memory_space<vmem>>, vector<2x64xf32>,
    %c1_i32 = arith.constant 1 : i32
    %c2_i32_61 = arith.constant 2 : i32
    %125 = arith.muli %c1_i32, %c2_i32_61 : i32
    %126 = arith.index_cast %125 : i32 to index
    %c0_62 = arith.constant 0 : index
    %127 = vector.load %arg18[%126, %c0_62] : memref<16x64xf32, #tpu.memory_space<vmem>>, vector<2x64xf32>
    %128 = arith.index_cast %125 : i32 to index
    %c0_63 = arith.constant 0 : index
    %129 = vector.load %arg19[%128, %c0_63] : memref<16x64xf32, #tpu.memory_space<vmem>>, vector<2x64xf32>
    %130 = arith.index_cast %125 : i32 to index
    %c0_64 = arith.constant 0 : index
    %131 = vector.load %arg20[%130, %c0_64] : memref<16x8xf32, #tpu.memory_space<vmem>>, vector<2x8xf32>
    %132 = arith.index_cast %125 : i32 to index
    %c0_65 = arith.constant 0 : index
    %133 = vector.load %arg21[%132, %c0_65] : memref<16x8xf32, #tpu.memory_space<vmem>>, vector<2x8xf32>
    %134 = vector.shape_cast %127 : vector<2x64xf32> to vector<2x1x64xf32>
    %135 = vector.shape_cast %95 : vector<8x64xf32> to vector<1x8x64xf32>
    %136 = vector.broadcast %134 : vector<2x1x64xf32> to vector<2x8x64xf32>
    %137 = vector.broadcast %135 : vector<1x8x64xf32> to vector<2x8x64xf32>
    %138 = arith.mulf %136, %137 : vector<2x8x64xf32>
    %139 = math.exp %138 : vector<2x8x64xf32>
    %140 = vector.shape_cast %131 : vector<2x8xf32> to vector<2x8x1xf32>
    %141 = vector.shape_cast %129 : vector<2x64xf32> to vector<2x1x64xf32>
    %142 = vector.broadcast %140 : vector<2x8x1xf32> to vector<2x8x64xf32>
    %143 = vector.broadcast %141 : vector<2x1x64xf32> to vector<2x8x64xf32>
    %144 = arith.mulf %142, %143 : vector<2x8x64xf32>
    %145 = arith.mulf %139, %118 : vector<2x8x64xf32>
    %146 = arith.addf %145, %144 : vector<2x8x64xf32>
    %147 = vector.shape_cast %133 : vector<2x8xf32> to vector<2x8x1xf32>
    %148 = vector.broadcast %147 : vector<2x8x1xf32> to vector<2x8x64xf32>
    %149 = arith.mulf %148, %146 : vector<2x8x64xf32>
    %cst_66 = arith.constant dense<0.000000e+00> : vector<2x64xf32>
    %150 = vector.multi_reduction <add>, %149, %cst_66 [1] : vector<2x8x64xf32> to vector<2x64xf32>
    %151 = arith.index_cast %125 : i32 to index
    %c0_67 = arith.constant 0 : index
    %152 = vector.load %arg22[%151, %c0_67] : memref<16x64xf32, #tpu.memory_space<vmem>>, vector<2x64xf32>
    tpu.vector_store %arg22[%151, %c0_67], %150 {strides = array<i32>} : memref<16x64xf32, #tpu.memory_space<vmem>>, vector<2x64xf32>,
    %c2_i32_68 = arith.constant 2 : i32
    %c2_i32_69 = arith.constant 2 : i32
    %153 = arith.muli %c2_i32_68, %c2_i32_69 : i32
    %154 = arith.index_cast %153 : i32 to index
    %c0_70 = arith.constant 0 : index
    %155 = vector.load %arg18[%154, %c0_70] : memref<16x64xf32, #tpu.memory_space<vmem>>, vector<2x64xf32>
    %156 = arith.index_cast %153 : i32 to index
    %c0_71 = arith.constant 0 : index
    %157 = vector.load %arg19[%156, %c0_71] : memref<16x64xf32, #tpu.memory_space<vmem>>, vector<2x64xf32>
    %158 = arith.index_cast %153 : i32 to index
    %c0_72 = arith.constant 0 : index
    %159 = vector.load %arg20[%158, %c0_72] : memref<16x8xf32, #tpu.memory_space<vmem>>, vector<2x8xf32>
    %160 = arith.index_cast %153 : i32 to index
    %c0_73 = arith.constant 0 : index
    %161 = vector.load %arg21[%160, %c0_73] : memref<16x8xf32, #tpu.memory_space<vmem>>, vector<2x8xf32>
    %162 = vector.shape_cast %155 : vector<2x64xf32> to vector<2x1x64xf32>
    %163 = vector.shape_cast %95 : vector<8x64xf32> to vector<1x8x64xf32>
    %164 = vector.broadcast %162 : vector<2x1x64xf32> to vector<2x8x64xf32>
    %165 = vector.broadcast %163 : vector<1x8x64xf32> to vector<2x8x64xf32>
    %166 = arith.mulf %164, %165 : vector<2x8x64xf32>
    %167 = math.exp %166 : vector<2x8x64xf32>
    %168 = vector.shape_cast %159 : vector<2x8xf32> to vector<2x8x1xf32>
    %169 = vector.shape_cast %157 : vector<2x64xf32> to vector<2x1x64xf32>
    %170 = vector.broadcast %168 : vector<2x8x1xf32> to vector<2x8x64xf32>
    %171 = vector.broadcast %169 : vector<2x1x64xf32> to vector<2x8x64xf32>
    %172 = arith.mulf %170, %171 : vector<2x8x64xf32>
    %173 = arith.mulf %167, %146 : vector<2x8x64xf32>
    %174 = arith.addf %173, %172 : vector<2x8x64xf32>
    %175 = vector.shape_cast %161 : vector<2x8xf32> to vector<2x8x1xf32>
    %176 = vector.broadcast %175 : vector<2x8x1xf32> to vector<2x8x64xf32>
    %177 = arith.mulf %176, %174 : vector<2x8x64xf32>
    %cst_74 = arith.constant dense<0.000000e+00> : vector<2x64xf32>
    %178 = vector.multi_reduction <add>, %177, %cst_74 [1] : vector<2x8x64xf32> to vector<2x64xf32>
    %179 = arith.index_cast %153 : i32 to index
    %c0_75 = arith.constant 0 : index
    %180 = vector.load %arg22[%179, %c0_75] : memref<16x64xf32, #tpu.memory_space<vmem>>, vector<2x64xf32>
    tpu.vector_store %arg22[%179, %c0_75], %178 {strides = array<i32>} : memref<16x64xf32, #tpu.memory_space<vmem>>, vector<2x64xf32>,
    %c3_i32 = arith.constant 3 : i32
    %c2_i32_76 = arith.constant 2 : i32
    %181 = arith.muli %c3_i32, %c2_i32_76 : i32
    %182 = arith.index_cast %181 : i32 to index
    %c0_77 = arith.constant 0 : index
    %183 = vector.load %arg18[%182, %c0_77] : memref<16x64xf32, #tpu.memory_space<vmem>>, vector<2x64xf32>
    %184 = arith.index_cast %181 : i32 to index
    %c0_78 = arith.constant 0 : index
    %185 = vector.load %arg19[%184, %c0_78] : memref<16x64xf32, #tpu.memory_space<vmem>>, vector<2x64xf32>
    %186 = arith.index_cast %181 : i32 to index
    %c0_79 = arith.constant 0 : index
    %187 = vector.load %arg20[%186, %c0_79] : memref<16x8xf32, #tpu.memory_space<vmem>>, vector<2x8xf32>
    %188 = arith.index_cast %181 : i32 to index
    %c0_80 = arith.constant 0 : index
    %189 = vector.load %arg21[%188, %c0_80] : memref<16x8xf32, #tpu.memory_space<vmem>>, vector<2x8xf32>
    %190 = vector.shape_cast %183 : vector<2x64xf32> to vector<2x1x64xf32>
    %191 = vector.shape_cast %95 : vector<8x64xf32> to vector<1x8x64xf32>
    %192 = vector.broadcast %190 : vector<2x1x64xf32> to vector<2x8x64xf32>
    %193 = vector.broadcast %191 : vector<1x8x64xf32> to vector<2x8x64xf32>
    %194 = arith.mulf %192, %193 : vector<2x8x64xf32>
    %195 = math.exp %194 : vector<2x8x64xf32>
    %196 = vector.shape_cast %187 : vector<2x8xf32> to vector<2x8x1xf32>
    %197 = vector.shape_cast %185 : vector<2x64xf32> to vector<2x1x64xf32>
    %198 = vector.broadcast %196 : vector<2x8x1xf32> to vector<2x8x64xf32>
    %199 = vector.broadcast %197 : vector<2x1x64xf32> to vector<2x8x64xf32>
    %200 = arith.mulf %198, %199 : vector<2x8x64xf32>
    %201 = arith.mulf %195, %174 : vector<2x8x64xf32>
    %202 = arith.addf %201, %200 : vector<2x8x64xf32>
    %203 = vector.shape_cast %189 : vector<2x8xf32> to vector<2x8x1xf32>
    %204 = vector.broadcast %203 : vector<2x8x1xf32> to vector<2x8x64xf32>
    %205 = arith.mulf %204, %202 : vector<2x8x64xf32>
    %cst_81 = arith.constant dense<0.000000e+00> : vector<2x64xf32>
    %206 = vector.multi_reduction <add>, %205, %cst_81 [1] : vector<2x8x64xf32> to vector<2x64xf32>
    %207 = arith.index_cast %181 : i32 to index
    %c0_82 = arith.constant 0 : index
    %208 = vector.load %arg22[%207, %c0_82] : memref<16x64xf32, #tpu.memory_space<vmem>>, vector<2x64xf32>
    tpu.vector_store %arg22[%207, %c0_82], %206 {strides = array<i32>} : memref<16x64xf32, #tpu.memory_space<vmem>>, vector<2x64xf32>,
    %c4_i32 = arith.constant 4 : i32
    %c2_i32_83 = arith.constant 2 : i32
    %209 = arith.muli %c4_i32, %c2_i32_83 : i32
    %210 = arith.index_cast %209 : i32 to index
    %c0_84 = arith.constant 0 : index
    %211 = vector.load %arg18[%210, %c0_84] : memref<16x64xf32, #tpu.memory_space<vmem>>, vector<2x64xf32>
    %212 = arith.index_cast %209 : i32 to index
    %c0_85 = arith.constant 0 : index
    %213 = vector.load %arg19[%212, %c0_85] : memref<16x64xf32, #tpu.memory_space<vmem>>, vector<2x64xf32>
    %214 = arith.index_cast %209 : i32 to index
    %c0_86 = arith.constant 0 : index
    %215 = vector.load %arg20[%214, %c0_86] : memref<16x8xf32, #tpu.memory_space<vmem>>, vector<2x8xf32>
    %216 = arith.index_cast %209 : i32 to index
    %c0_87 = arith.constant 0 : index
    %217 = vector.load %arg21[%216, %c0_87] : memref<16x8xf32, #tpu.memory_space<vmem>>, vector<2x8xf32>
    %218 = vector.shape_cast %211 : vector<2x64xf32> to vector<2x1x64xf32>
    %219 = vector.shape_cast %95 : vector<8x64xf32> to vector<1x8x64xf32>
    %220 = vector.broadcast %218 : vector<2x1x64xf32> to vector<2x8x64xf32>
    %221 = vector.broadcast %219 : vector<1x8x64xf32> to vector<2x8x64xf32>
    %222 = arith.mulf %220, %221 : vector<2x8x64xf32>
    %223 = math.exp %222 : vector<2x8x64xf32>
    %224 = vector.shape_cast %215 : vector<2x8xf32> to vector<2x8x1xf32>
    %225 = vector.shape_cast %213 : vector<2x64xf32> to vector<2x1x64xf32>
    %226 = vector.broadcast %224 : vector<2x8x1xf32> to vector<2x8x64xf32>
    %227 = vector.broadcast %225 : vector<2x1x64xf32> to vector<2x8x64xf32>
    %228 = arith.mulf %226, %227 : vector<2x8x64xf32>
    %229 = arith.mulf %223, %202 : vector<2x8x64xf32>
    %230 = arith.addf %229, %228 : vector<2x8x64xf32>
    %231 = vector.shape_cast %217 : vector<2x8xf32> to vector<2x8x1xf32>
    %232 = vector.broadcast %231 : vector<2x8x1xf32> to vector<2x8x64xf32>
    %233 = arith.mulf %232, %230 : vector<2x8x64xf32>
    %cst_88 = arith.constant dense<0.000000e+00> : vector<2x64xf32>
    %234 = vector.multi_reduction <add>, %233, %cst_88 [1] : vector<2x8x64xf32> to vector<2x64xf32>
    %235 = arith.index_cast %209 : i32 to index
    %c0_89 = arith.constant 0 : index
    %236 = vector.load %arg22[%235, %c0_89] : memref<16x64xf32, #tpu.memory_space<vmem>>, vector<2x64xf32>
    tpu.vector_store %arg22[%235, %c0_89], %234 {strides = array<i32>} : memref<16x64xf32, #tpu.memory_space<vmem>>, vector<2x64xf32>,
    %c5_i32 = arith.constant 5 : i32
    %c2_i32_90 = arith.constant 2 : i32
    %237 = arith.muli %c5_i32, %c2_i32_90 : i32
    %238 = arith.index_cast %237 : i32 to index
    %c0_91 = arith.constant 0 : index
    %239 = vector.load %arg18[%238, %c0_91] : memref<16x64xf32, #tpu.memory_space<vmem>>, vector<2x64xf32>
    %240 = arith.index_cast %237 : i32 to index
    %c0_92 = arith.constant 0 : index
    %241 = vector.load %arg19[%240, %c0_92] : memref<16x64xf32, #tpu.memory_space<vmem>>, vector<2x64xf32>
    %242 = arith.index_cast %237 : i32 to index
    %c0_93 = arith.constant 0 : index
    %243 = vector.load %arg20[%242, %c0_93] : memref<16x8xf32, #tpu.memory_space<vmem>>, vector<2x8xf32>
    %244 = arith.index_cast %237 : i32 to index
    %c0_94 = arith.constant 0 : index
    %245 = vector.load %arg21[%244, %c0_94] : memref<16x8xf32, #tpu.memory_space<vmem>>, vector<2x8xf32>
    %246 = vector.shape_cast %239 : vector<2x64xf32> to vector<2x1x64xf32>
    %247 = vector.shape_cast %95 : vector<8x64xf32> to vector<1x8x64xf32>
    %248 = vector.broadcast %246 : vector<2x1x64xf32> to vector<2x8x64xf32>
    %249 = vector.broadcast %247 : vector<1x8x64xf32> to vector<2x8x64xf32>
    %250 = arith.mulf %248, %249 : vector<2x8x64xf32>
    %251 = math.exp %250 : vector<2x8x64xf32>
    %252 = vector.shape_cast %243 : vector<2x8xf32> to vector<2x8x1xf32>
    %253 = vector.shape_cast %241 : vector<2x64xf32> to vector<2x1x64xf32>
    %254 = vector.broadcast %252 : vector<2x8x1xf32> to vector<2x8x64xf32>
    %255 = vector.broadcast %253 : vector<2x1x64xf32> to vector<2x8x64xf32>
    %256 = arith.mulf %254, %255 : vector<2x8x64xf32>
    %257 = arith.mulf %251, %230 : vector<2x8x64xf32>
    %258 = arith.addf %257, %256 : vector<2x8x64xf32>
    %259 = vector.shape_cast %245 : vector<2x8xf32> to vector<2x8x1xf32>
    %260 = vector.broadcast %259 : vector<2x8x1xf32> to vector<2x8x64xf32>
    %261 = arith.mulf %260, %258 : vector<2x8x64xf32>
    %cst_95 = arith.constant dense<0.000000e+00> : vector<2x64xf32>
    %262 = vector.multi_reduction <add>, %261, %cst_95 [1] : vector<2x8x64xf32> to vector<2x64xf32>
    %263 = arith.index_cast %237 : i32 to index
    %c0_96 = arith.constant 0 : index
    %264 = vector.load %arg22[%263, %c0_96] : memref<16x64xf32, #tpu.memory_space<vmem>>, vector<2x64xf32>
    tpu.vector_store %arg22[%263, %c0_96], %262 {strides = array<i32>} : memref<16x64xf32, #tpu.memory_space<vmem>>, vector<2x64xf32>,
    %c6_i32 = arith.constant 6 : i32
    %c2_i32_97 = arith.constant 2 : i32
    %265 = arith.muli %c6_i32, %c2_i32_97 : i32
    %266 = arith.index_cast %265 : i32 to index
    %c0_98 = arith.constant 0 : index
    %267 = vector.load %arg18[%266, %c0_98] : memref<16x64xf32, #tpu.memory_space<vmem>>, vector<2x64xf32>
    %268 = arith.index_cast %265 : i32 to index
    %c0_99 = arith.constant 0 : index
    %269 = vector.load %arg19[%268, %c0_99] : memref<16x64xf32, #tpu.memory_space<vmem>>, vector<2x64xf32>
    %270 = arith.index_cast %265 : i32 to index
    %c0_100 = arith.constant 0 : index
    %271 = vector.load %arg20[%270, %c0_100] : memref<16x8xf32, #tpu.memory_space<vmem>>, vector<2x8xf32>
    %272 = arith.index_cast %265 : i32 to index
    %c0_101 = arith.constant 0 : index
    %273 = vector.load %arg21[%272, %c0_101] : memref<16x8xf32, #tpu.memory_space<vmem>>, vector<2x8xf32>
    %274 = vector.shape_cast %267 : vector<2x64xf32> to vector<2x1x64xf32>
    %275 = vector.shape_cast %95 : vector<8x64xf32> to vector<1x8x64xf32>
    %276 = vector.broadcast %274 : vector<2x1x64xf32> to vector<2x8x64xf32>
    %277 = vector.broadcast %275 : vector<1x8x64xf32> to vector<2x8x64xf32>
    %278 = arith.mulf %276, %277 : vector<2x8x64xf32>
    %279 = math.exp %278 : vector<2x8x64xf32>
    %280 = vector.shape_cast %271 : vector<2x8xf32> to vector<2x8x1xf32>
    %281 = vector.shape_cast %269 : vector<2x64xf32> to vector<2x1x64xf32>
    %282 = vector.broadcast %280 : vector<2x8x1xf32> to vector<2x8x64xf32>
    %283 = vector.broadcast %281 : vector<2x1x64xf32> to vector<2x8x64xf32>
    %284 = arith.mulf %282, %283 : vector<2x8x64xf32>
    %285 = arith.mulf %279, %258 : vector<2x8x64xf32>
    %286 = arith.addf %285, %284 : vector<2x8x64xf32>
    %287 = vector.shape_cast %273 : vector<2x8xf32> to vector<2x8x1xf32>
    %288 = vector.broadcast %287 : vector<2x8x1xf32> to vector<2x8x64xf32>
    %289 = arith.mulf %288, %286 : vector<2x8x64xf32>
    %cst_102 = arith.constant dense<0.000000e+00> : vector<2x64xf32>
    %290 = vector.multi_reduction <add>, %289, %cst_102 [1] : vector<2x8x64xf32> to vector<2x64xf32>
    %291 = arith.index_cast %265 : i32 to index
    %c0_103 = arith.constant 0 : index
    %292 = vector.load %arg22[%291, %c0_103] : memref<16x64xf32, #tpu.memory_space<vmem>>, vector<2x64xf32>
    tpu.vector_store %arg22[%291, %c0_103], %290 {strides = array<i32>} : memref<16x64xf32, #tpu.memory_space<vmem>>, vector<2x64xf32>,
    %c7_i32 = arith.constant 7 : i32
    %c2_i32_104 = arith.constant 2 : i32
    %293 = arith.muli %c7_i32, %c2_i32_104 : i32
    %294 = arith.index_cast %293 : i32 to index
    %c0_105 = arith.constant 0 : index
    %295 = vector.load %arg18[%294, %c0_105] : memref<16x64xf32, #tpu.memory_space<vmem>>, vector<2x64xf32>
    %296 = arith.index_cast %293 : i32 to index
    %c0_106 = arith.constant 0 : index
    %297 = vector.load %arg19[%296, %c0_106] : memref<16x64xf32, #tpu.memory_space<vmem>>, vector<2x64xf32>
    %298 = arith.index_cast %293 : i32 to index
    %c0_107 = arith.constant 0 : index
    %299 = vector.load %arg20[%298, %c0_107] : memref<16x8xf32, #tpu.memory_space<vmem>>, vector<2x8xf32>
    %300 = arith.index_cast %293 : i32 to index
    %c0_108 = arith.constant 0 : index
    %301 = vector.load %arg21[%300, %c0_108] : memref<16x8xf32, #tpu.memory_space<vmem>>, vector<2x8xf32>
    %302 = vector.shape_cast %295 : vector<2x64xf32> to vector<2x1x64xf32>
    %303 = vector.shape_cast %95 : vector<8x64xf32> to vector<1x8x64xf32>
    %304 = vector.broadcast %302 : vector<2x1x64xf32> to vector<2x8x64xf32>
    %305 = vector.broadcast %303 : vector<1x8x64xf32> to vector<2x8x64xf32>
    %306 = arith.mulf %304, %305 : vector<2x8x64xf32>
    %307 = math.exp %306 : vector<2x8x64xf32>
    %308 = vector.shape_cast %299 : vector<2x8xf32> to vector<2x8x1xf32>
    %309 = vector.shape_cast %297 : vector<2x64xf32> to vector<2x1x64xf32>
    %310 = vector.broadcast %308 : vector<2x8x1xf32> to vector<2x8x64xf32>
    %311 = vector.broadcast %309 : vector<2x1x64xf32> to vector<2x8x64xf32>
    %312 = arith.mulf %310, %311 : vector<2x8x64xf32>
    %313 = arith.mulf %307, %286 : vector<2x8x64xf32>
    %314 = arith.addf %313, %312 : vector<2x8x64xf32>
    %315 = vector.shape_cast %301 : vector<2x8xf32> to vector<2x8x1xf32>
    %316 = vector.broadcast %315 : vector<2x8x1xf32> to vector<2x8x64xf32>
    %317 = arith.mulf %316, %314 : vector<2x8x64xf32>
    %cst_109 = arith.constant dense<0.000000e+00> : vector<2x64xf32>
    %318 = vector.multi_reduction <add>, %317, %cst_109 [1] : vector<2x8x64xf32> to vector<2x64xf32>
    %319 = arith.index_cast %293 : i32 to index
    %c0_110 = arith.constant 0 : index
    %320 = vector.load %arg22[%319, %c0_110] : memref<16x64xf32, #tpu.memory_space<vmem>>, vector<2x64xf32>
    tpu.vector_store %arg22[%319, %c0_110], %318 {strides = array<i32>} : memref<16x64xf32, #tpu.memory_space<vmem>>, vector<2x64xf32>,
    %c8_i32 = arith.constant 8 : i32
    %c0_111 = arith.constant 0 : index
    %c0_112 = arith.constant 0 : index
    %321 = vector.load %arg22[%c0_111, %c0_112] : memref<16x64xf32, #tpu.memory_space<vmem>>, vector<16x64xf32>
    %c0_113 = arith.constant 0 : index
    %c0_114 = arith.constant 0 : index
    %c0_115 = arith.constant 0 : index
    %322 = vector.load %arg11[%c0_113, %c0_114, %c0_115] : memref<1x1x64xf32, #tpu.memory_space<vmem>>, vector<1x1x64xf32>
    %323 = vector.shape_cast %322 : vector<1x1x64xf32> to vector<1x64xf32>
    %324 = vector.broadcast %323 : vector<1x64xf32> to vector<16x64xf32>
    %325 = arith.mulf %324, %71 : vector<16x64xf32>
    %326 = arith.addf %321, %325 : vector<16x64xf32>
    %327 = arith.negf %38 : vector<16x64xf32>
    %328 = math.exp %327 : vector<16x64xf32>
    %cst_116 = arith.constant 1.000000e+00 : f32
    %329 = vector.broadcast %cst_116 : f32 to vector<16x64xf32>
    %330 = arith.addf %329, %328 : vector<16x64xf32>
    %331 = arith.divf %329, %330 : vector<16x64xf32>
    %332 = arith.mulf %38, %331 : vector<16x64xf32>
    %333 = arith.mulf %326, %332 : vector<16x64xf32>
    %c0_117 = arith.constant 0 : index
    %c0_118 = arith.constant 0 : index
    %c0_119 = arith.constant 0 : index
    %334 = vector.load %arg12[%c0_117, %c0_118, %c0_119] : memref<1x64x32xf32, #tpu.memory_space<vmem>>, vector<1x64x32xf32>
    %335 = vector.shape_cast %334 : vector<1x64x32xf32> to vector<64x32xf32>
    %cst_120 = arith.constant dense<0.000000e+00> : vector<16x32xf32>
    %336 = tpu.matmul %333, %335, %cst_120 {dimension_numbers = #tpu.dot_dimension_numbers<[1], [0], [0], [1], [0, 0, 1, 1], [], []>} : vector<16x64xf32>, vector<64x32xf32>, vector<16x32xf32> -> vector<16x32xf32>
    %c0_121 = arith.constant 0 : index
    %c0_122 = arith.constant 0 : index
    %c0_123 = arith.constant 0 : index
    %337 = vector.load %arg13[%c0_121, %c0_122, %c0_123] : memref<1x1x32xf32, #tpu.memory_space<vmem>>, vector<1x1x32xf32>
    %338 = vector.shape_cast %337 : vector<1x1x32xf32> to vector<1x32xf32>
    %339 = vector.broadcast %338 : vector<1x32xf32> to vector<16x32xf32>
    %340 = arith.addf %336, %339 : vector<16x32xf32>
    %c0_124 = arith.constant 0 : index
    %c0_125 = arith.constant 0 : index
    %c0_126 = arith.constant 0 : index
    %341 = vector.load %arg14[%c0_124, %c0_125, %c0_126] : memref<1x1x32xf32, #tpu.memory_space<vmem>>, vector<1x1x32xf32>
    %342 = vector.shape_cast %341 : vector<1x1x32xf32> to vector<1x32xf32>
    %343 = vector.broadcast %342 : vector<1x32xf32> to vector<16x32xf32>
    %344 = arith.mulf %343, %340 : vector<16x32xf32>
    %345 = arith.addf %3, %344 : vector<16x32xf32>
    %c0_127 = arith.constant 0 : index
    %c0_128 = arith.constant 0 : index
    %346 = vector.load %arg16[%c0_127, %c0_128] : memref<16x32xf32, #tpu.memory_space<vmem>>, vector<16x32xf32>
    tpu.vector_store %arg16[%c0_127, %c0_128], %345 {strides = array<i32>} : memref<16x32xf32, #tpu.memory_space<vmem>>, vector<16x32xf32>,
    %c0_129 = arith.constant 0 : index
    %c0_130 = arith.constant 0 : index
    %347 = vector.load %arg15[%c0_129, %c0_130] : memref<16x32xf32, #tpu.memory_space<vmem>>, vector<16x32xf32>
    tpu.vector_store %arg15[%c0_129, %c0_130], %345 {strides = array<i32>} : memref<16x32xf32, #tpu.memory_space<vmem>>, vector<16x32xf32>,
    return
  }
  func.func @transform_0(%arg0: i32) -> (i32, i32) {
    %c0_i32 = arith.constant 0 : i32
    %c0_i32_0 = arith.constant 0 : i32
    %c0_i32_1 = arith.constant 0 : i32
    return %c0_i32, %c0_i32_0 : i32, i32
  }
  func.func @transform_1(%arg0: i32) -> (i32, i32, i32) {
    %c0_i32 = arith.constant 0 : i32
    %c0_i32_0 = arith.constant 0 : i32
    %c0_i32_1 = arith.constant 0 : i32
    return %arg0, %c0_i32, %c0_i32_0 : i32, i32, i32
  }
  func.func @transform_2(%arg0: i32) -> (i32, i32, i32) {
    %c0_i32 = arith.constant 0 : i32
    %c0_i32_0 = arith.constant 0 : i32
    %c0_i32_1 = arith.constant 0 : i32
    return %arg0, %c0_i32, %c0_i32_0 : i32, i32, i32
  }
  func.func @transform_3(%arg0: i32) -> (i32, i32, i32) {
    %c0_i32 = arith.constant 0 : i32
    %c0_i32_0 = arith.constant 0 : i32
    %c0_i32_1 = arith.constant 0 : i32
    return %arg0, %c0_i32, %c0_i32_0 : i32, i32, i32
  }
  func.func @transform_4(%arg0: i32) -> (i32, i32, i32) {
    %c0_i32 = arith.constant 0 : i32
    %c0_i32_0 = arith.constant 0 : i32
    %c0_i32_1 = arith.constant 0 : i32
    return %arg0, %c0_i32, %c0_i32_0 : i32, i32, i32
  }
  func.func @transform_5(%arg0: i32) -> (i32, i32, i32) {
    %c0_i32 = arith.constant 0 : i32
    %c0_i32_0 = arith.constant 0 : i32
    %c0_i32_1 = arith.constant 0 : i32
    return %arg0, %c0_i32, %c0_i32_0 : i32, i32, i32
  }
  func.func @transform_6(%arg0: i32) -> (i32, i32, i32) {
    %c0_i32 = arith.constant 0 : i32
    %c0_i32_0 = arith.constant 0 : i32
    %c0_i32_1 = arith.constant 0 : i32
    return %arg0, %c0_i32, %c0_i32_0 : i32, i32, i32
  }
  func.func @transform_7(%arg0: i32) -> (i32, i32, i32) {
    %c0_i32 = arith.constant 0 : i32
    %c0_i32_0 = arith.constant 0 : i32
    %c0_i32_1 = arith.constant 0 : i32
    return %arg0, %c0_i32, %c0_i32_0 : i32, i32, i32
  }
  func.func @transform_8(%arg0: i32) -> (i32, i32, i32) {
    %c0_i32 = arith.constant 0 : i32
    %c0_i32_0 = arith.constant 0 : i32
    %c0_i32_1 = arith.constant 0 : i32
    return %arg0, %c0_i32, %c0_i32_0 : i32, i32, i32
  }
  func.func @transform_9(%arg0: i32) -> (i32, i32, i32) {
    %c0_i32 = arith.constant 0 : i32
    %c0_i32_0 = arith.constant 0 : i32
    %c0_i32_1 = arith.constant 0 : i32
    return %arg0, %c0_i32, %c0_i32_0 : i32, i32, i32
  }
  func.func @transform_10(%arg0: i32) -> (i32, i32, i32) {
    %c0_i32 = arith.constant 0 : i32
    %c0_i32_0 = arith.constant 0 : i32
    %c0_i32_1 = arith.constant 0 : i32
    return %arg0, %c0_i32, %c0_i32_0 : i32, i32, i32
  }
  func.func @transform_11(%arg0: i32) -> (i32, i32, i32) {
    %c0_i32 = arith.constant 0 : i32
    %c0_i32_0 = arith.constant 0 : i32
    %c0_i32_1 = arith.constant 0 : i32
    return %arg0, %c0_i32, %c0_i32_0 : i32, i32, i32
  }
  func.func @transform_12(%arg0: i32) -> (i32, i32, i32) {
    %c0_i32 = arith.constant 0 : i32
    %c0_i32_0 = arith.constant 0 : i32
    %c0_i32_1 = arith.constant 0 : i32
    return %arg0, %c0_i32, %c0_i32_0 : i32, i32, i32
  }
  func.func @transform_13(%arg0: i32) -> (i32, i32, i32) {
    %c0_i32 = arith.constant 0 : i32
    %c0_i32_0 = arith.constant 0 : i32
    %c0_i32_1 = arith.constant 0 : i32
    return %arg0, %c0_i32, %c0_i32_0 : i32, i32, i32
  }
  func.func @transform_14(%arg0: i32) -> (i32, i32) {
    %c0_i32 = arith.constant 0 : i32
    %c0_i32_0 = arith.constant 0 : i32
    %c0_i32_1 = arith.constant 0 : i32
    return %c0_i32, %c0_i32_0 : i32, i32
  }
}

</mosaic_0001>

<bundles_post_ra>
// kernel: mamba_layer_forward.1
= control target key start
LH: loop header
LB: loop body
LE: loop exit
PB: predicated region body
PF: predicated region fallthrough
CT: control target
= control target key end

     0   :  { %s2010_s29 = smov 0   ;;  %s2297_s0 = inlined_call_operand.vmem [shape: f32[16,32], index: 0, kind: input, shape index: {}]   ;;  %s2298_s1 = inlined_call_operand.vmem [shape: f32[2,1,32], index: 1, kind: input, shape index: {}]   ;;  %s2299_s2 = inlined_call_operand.vmem [shape: f32[2,1,32], index: 2, kind: input, shape index: {}]   ;;  %s2300_s3 = inlined_call_operand.vmem [shape: f32[2,32,128], index: 3, kind: input, shape index: {}]   ;;  %s2301_s4 = inlined_call_operand.vmem [shape: f32[2,1,128], index: 4, kind: input, shape index: {}]   ;;  %s2302_s5 = inlined_call_operand.vmem [shape: f32[2,4,64], index: 5, kind: input, shape index: {}]   ;;  %s2303_s6 = inlined_call_operand.vmem [shape: f32[2,1,64], index: 6, kind: input, shape index: {}]   ;;  %s2304_s7 = inlined_call_operand.vmem [shape: f32[2,64,80], index: 7, kind: input, shape index: {}]   ;;  %s2305_s8 = inlined_call_operand.vmem [shape: f32[2,1,80], index: 8, kind: input, shape index: {}]   ;;  %s2306_s9 = inlined_call_operand.vmem [shape: f32[2,8,64], index: 9, kind: input, shape index: {}]   ;;  %s2307_s10 = inlined_call_operand.vmem [shape: f32[2,1,64], index: 10, kind: input, shape index: {}]   ;;  %s2308_s11 = inlined_call_operand.vmem [shape: f32[2,64,32], index: 11, kind: input, shape index: {}]   ;;  %s2309_s12 = inlined_call_operand.vmem [shape: f32[2,1,32], index: 12, kind: input, shape index: {}]   ;;  %s2310_s13 = inlined_call_operand.vmem [shape: f32[2,1,32], index: 13, kind: input, shape index: {}]   ;;  %s2311_s14 = inlined_call_operand.vmem [shape: f32[16,32], index: 14, kind: output, shape index: {}]  }
   0x1   :  { %2314 = sst [smem:[#allocation10_spill]] %s2298_s1 }
   0x2   :  { %2315 = sst [smem:[#allocation11_spill]] %s2299_s2 }
   0x3   :  { %2316 = sst [smem:[#allocation12_spill]] %s2300_s3 }
   0x4   :  { %2317 = sst [smem:[#allocation13_spill]] %s2302_s5 }
   0x5   :  { %2318 = sst [smem:[#allocation14_spill]] %s2304_s7 }
   0x6   :  { %2319 = sst [smem:[#allocation15_spill]] %s2311_s14 }
   0x7 LB: > { %2320 = sst [smem:[#allocation9_spill]] %s1929_s29  ;;  %s1800_s30 = sadd.s32 4294967295, %s1929_s29   ;;  %s1929_s29 = sphi %s2010_s29, %s24_s29  }
   0x8   : > { %p1803_p0 = scmp.ge.s32.totalorder %s1929_s29, 1  ;;  %p509_p1 = scmp.lt.s32.totalorder %s1929_s29, 3 }
   0xa   : > { %p510_p2 = pnand %p1803_p0, %p509_p1 }
   0xb   : > { %p592_p3 = scmp.lt.s32.totalorder (!%p510_p2), %s1800_s30, 1  ;;  %s2323_s3 = sld [smem:[#allocation12_spill]] (!%p510_p2) }
   0xc   : > { %513 = sbr.rel (%p510_p2) target bundleno = 1076 (0x434), region = 76  ;;  %s2324_s5 = sld [smem:[#allocation13_spill]] (!%p510_p2) }
   0xd   : > { %s2325_s7 = sld [smem:[#allocation14_spill]] (!%p510_p2)  ;;  %p1812_p4 = scmp.ne.s32.totalorder (!%p510_p2), %s1800_s30, 0 }
  0x11   : > { %s2018_s15 = scalar_select %p592_p3, %s1800_s30, 1 }
  0x13   : > { %s1825_s22 = sshll.u32 %s2018_s15, 5  ;;  %s1806_s16 = sshll.u32 %s2018_s15, 2 }
  0x14   : > { %s2036_s28 = scalar_lea.vmem %s2323_s3, %s1825_s22  ;;  %s2042_s18 = scalar_lea.vmem %s2324_s5, %s1806_s16 }
  0x15   : > { %s1826_s21 = sshll.u32 %s2018_s15, 6  ;;  %s1809_s26 = sshll.u32 %s2018_s15, 3 }
  0x16   : > { %s2056_s22 = scalar_lea.vmem %s2325_s7, %s1826_s21  ;;  %s2062_s29 = scalar_lea.vmem %s2306_s9, %s1809_s26 }
  0x17   : > { %s627_s14 = scalar_lea.vmem %s2307_s10, %s2018_s15  ;;  %s2071_s1 = scalar_lea.vmem %s2308_s11, %s1826_s21 }
  0x18   : > { %s635_s25 = scalar_lea.vmem %s2309_s12, %s2018_s15  ;;  %s638_s7 = scalar_lea.vmem %s2310_s13, %s2018_s15 }
  0x19   : > { %642 = sbr.rel (%p1812_p4) target bundleno = 33 (0x21), region = 80 }
  0x1e   : > { %v643_v0 = vld [vmem:[%s2297_s0] sm:$0xff]  ;;  %vm645_vm0 = vcmask 261120   ;;  %v644_v1 = vld [vmem:[%s2297_s0 + $0x8] sm:$0xff] }
  0x1f   : > { %646 = vst.msk [vmem:[#allocation2] sm:$0xff] %vm645_vm0, %v643_v0 }
  0x20   : > { %647 = vst.msk [vmem:[#allocation2 + $0x8] sm:$0xff] %vm645_vm0, %v644_v1 }
  0x21 PF: > { %vm650_vm1 = vcmask 261120   ;;  %v1931_v6 = vmov 32.0   ;;  %v717_v23 = vld [vmem:[%s2036_s28 + $0x18] sm:$0xff]  ;;  %v716_v24 = vld [vmem:[%s2036_s28 + $0x10] sm:$0xff]  ;;  %v715_v25 = vld [vmem:[%s2036_s28 + $0x8] sm:$0xff]  ;;  %s2326_s21 = sld [smem:[#allocation10_spill]]  ;;  %s2330_s3 = scalar_lea.vmem %s2301_s4, %s2018_s15 }
  0x22   : > { %1859 = vrcp.f32 %v1931_v6  ;;  %740 = vmatpush.msra.mxu0 %v717_v23  ;;  %v714_v26 = vld [vmem:[%s2036_s28] sm:$0xff]  ;;  %s2328_s17 = sld [smem:[#allocation11_spill]]  ;;  %vm751_vm9 = vcmask 523264   ;;  %v1932_v55 = vmov 0.0   ;;  %v833_v56 = vld [vmem:[%s2056_s22 + $0x38] sm:$0xff]  ;;  %v832_v57 = vld [vmem:[%s2056_s22 + $0x30] sm:$0xff]  ;;  %s2331_s26 = scalar_lea.vmem %s2303_s6, %s2018_s15 }
  0x23   : > { %752 = vst.msk [vmem:[#allocation3] sm:$0xff] %vm751_vm9, %v1932_v55  ;;  %852 = vmatpush.msra.mxu1 %v833_v56  ;;  %1828 = vmatpush.msra.mxu3 %v833_v56  ;;  %v831_v58 = vld [vmem:[%s2056_s22 + $0x28] sm:$0xff]  ;;  %v830_v59 = vld [vmem:[%s2056_s22 + $0x20] sm:$0xff]  ;;  %v829_v60 = vld [vmem:[%s2056_s22 + $0x18] sm:$0xff]  ;;  %s2332_s5 = scalar_lea.vmem %s2305_s8, %s2018_s15  ;;  %s1933_s30 = smov 56  }
  0x24   : > { %741 = vmatpush.msra.mxu0 %v716_v24  ;;  %v1853_v61 = vld [vmem:[%s2330_s3] ss:$0 sm:$0xff]  ;;  %v828_v62 = vld [vmem:[%s2056_s22 + $0x10] sm:$0xff]  ;;  %v827_v0 = vld [vmem:[%s2056_s22 + $0x8] sm:$0xff]  ;;  %s2333_s2 = sld [smem:[#allocation15_spill]] }
  0x25   : > { %853 = vmatpush.msra.mxu1 %v832_v57  ;;  %1829 = vmatpush.msra.mxu3 %v832_v57 }
  0x26   : > { %v648_v2 = vld [vmem:[#allocation2] sm:$0xff]  ;;  %742 = vmatpush.msra.mxu0 %v715_v25 }
  0x27   : > { %v651_v3 = vsel %vm650_vm1, %v648_v2, 0.0  ;;  %v649_v4 = vld [vmem:[#allocation2 + $0x8] sm:$0xff]  ;;  %s2327_s28 = scalar_lea.vmem %s2326_s21, %s2018_s15  ;;  %854 = vmatpush.msra.mxu1 %v831_v58  ;;  %1830 = vmatpush.msra.mxu3 %v831_v58  ;;  %s1934_s21 = smov 64  }
  0x28   : > { %652 = vadd.xlane.f32.xlu0 %v651_v3  ;;  %v654_v5 = vsel %vm650_vm1, %v649_v4, 0.0  ;;  %v1860_v7 = vpop.eup %1859  ;;  %743 = vmatpush.msra.mxu0 %v714_v26  ;;  %v1851_v41 = vld [vmem:[%s2327_s28] ss:$0 sm:$0xff]  ;;  %s2329_s19 = scalar_lea.vmem %s2328_s17, %s2018_s15 }
  0x29   : > { %v658_v8 = vmul.f32 32.0, %v1860_v7  ;;  %vm662_vm2 = vweird.f32 %v1860_v7  ;;  %v1852_v45 = vld [vmem:[%s2329_s19] ss:$0 sm:$0xff]  ;;  %855 = vmatpush.msra.mxu1 %v830_v59  ;;  %1831 = vmatpush.msra.mxu3 %v830_v59 }
  0x2a   : > { %v755_v3 = vld [vmem:[%s2042_s18] sm:$0xf] }
  0x2b   : > { %v659_v9 = vsub.f32 1.0, %v658_v8  ;;  %856 = vmatpush.msra.mxu1 %v829_v60  ;;  %1832 = vmatpush.msra.mxu3 %v829_v60  ;;  %v768_v8 = vperm.slane %v755_v3, 1 }
  0x2d   : > { %v660_v10 = vmul.f32 %v1860_v7, %v659_v9  ;;  %857 = vmatpush.msra.mxu1 %v828_v62  ;;  %1833 = vmatpush.msra.mxu3 %v828_v62 }
  0x2f   : > { %v661_v11 = vadd.f32 %v1860_v7, %v660_v10  ;;  %858 = vmatpush.msra.mxu1 %v827_v0  ;;  %1834 = vmatpush.msra.mxu3 %v827_v0 }
  0x30   : > { %655 = vadd.xlane.f32.xlu0 %v654_v5  ;;  %v761_v5 = vperm.slane %v755_v3, 0 }
  0x31   : > { %v663_v12 = vsel %vm662_vm2, %v1860_v7, %v661_v11 }
  0x9b   : > { %v653_v13 = vpop.xlane.xlu0 %652 }
  0x9c   : > { %v664_v14 = vmul.f32 %v663_v12, %v653_v13  ;;  %v775_v13 = vperm.slane %v755_v3, 2 }
  0x9e   : > { %v666_v15 = vsub.f32 %v648_v2, %v664_v14  ;;  %v826_v2 = vld [vmem:[%s2056_s22] sm:$0xff] }
  0x9f   : > { %859 = vmatpush.msra.mxu1 %v826_v2  ;;  %1835 = vmatpush.msra.mxu3 %v826_v2 }
  0xa0   : > { %v668_v16 = vmul.f32 %v666_v15, %v666_v15 }
  0xa2   : > { %v670_v17 = vsel %vm650_vm1, %v668_v16, 0.0 }
  0xa3   : > { %671 = vadd.xlane.f32.xlu1 %v670_v17  ;;  %v656_v18 = vpop.xlane.xlu0 %655 }
  0xa4   : > { %v665_v19 = vmul.f32 %v663_v12, %v656_v18 }
  0xa6   : > { %v667_v20 = vsub.f32 %v649_v4, %v665_v19  ;;  %v756_v4 = vperm.slane %v755_v3, 3  ;;  %v1854_v19 = vld [vmem:[%s2331_s26] ss:$0 sm:$0xff] }
  0xa8   : > { %v669_v21 = vmul.f32 %v667_v20, %v667_v20 }
  0xaa   : > { %v673_v22 = vsel %vm650_vm1, %v669_v21, 0.0 }
  0xab   : > { %674 = vadd.xlane.f32.xlu1 %v673_v22 }
 0x116   : > { %v672_v27 = vpop.xlane.xlu1 %671 }
 0x117   : > { %v676_v28 = vmul.f32 %v672_v27, %v663_v12 }
 0x119   : > { %v678_v29 = vadd.f32 1e-05, %v676_v28 }
 0x11b   : > { %1861 = vrsqrt.f32 %v678_v29  ;;  %vm686_vm4 = vweird.f32 %v678_v29 }
 0x11e   : > { %v675_v30 = vpop.xlane.xlu1 %674 }
 0x11f   : > { %v677_v31 = vmul.f32 %v675_v30, %v663_v12 }
 0x121   : > { %v1862_v32 = vpop.eup %1861  ;;  %v679_v33 = vadd.f32 1e-05, %v677_v31 }
 0x122   : > { %v681_v34 = vmul.f32 %v1862_v32, %v678_v29  ;;  %vm687_vm3 = vweird.f32 %v1862_v32 }
 0x123   : > { %1863 = vrsqrt.f32 %v679_v33  ;;  %vm688_vm5 = vmor %vm686_vm4, %vm687_vm3  ;;  %vm696_vm6 = vweird.f32 %v679_v33 }
 0x124   : > { %v682_v35 = vmul.f32 %v1862_v32, %v681_v34 }
 0x126   : > { %v683_v36 = vmul.f32 0.5, %v682_v35 }
 0x128   : > { %v684_v37 = vsub.f32 1.5, %v683_v36 }
 0x129   : > { %v1864_v38 = vpop.eup %1863 }
 0x12a   : > { %v685_v39 = vmul.f32 %v1862_v32, %v684_v37  ;;  %v691_v40 = vmul.f32 %v1864_v38, %v679_v33  ;;  %vm697_vm7 = vweird.f32 %v1864_v38 }
 0x12b   : > { %vm698_vm8 = vmor %vm696_vm6, %vm697_vm7  ;;  %vm909_vm7 = vcmask 64512  }
 0x12c   : > { %v689_v42 = vsel %vm688_vm5, %v1862_v32, %v685_v39  ;;  %v692_v43 = vmul.f32 %v1864_v38, %v691_v40 }
 0x12d   : > { %v700_v44 = vmul.f32 %v689_v42, %v666_v15 }
 0x12e   : > { %v693_v46 = vmul.f32 0.5, %v692_v43 }
 0x12f   : > { %v706_v47 = vmul.f32 %v1851_v41, %v700_v44 }
 0x130   : > { %v694_v48 = vsub.f32 1.5, %v693_v46 }
 0x131   : > { %v712_v49 = vadd.f32 %v1852_v45, %v706_v47 }
 0x132   : > { %v695_v50 = vmul.f32 %v1864_v38, %v694_v48 }
 0x133   : > { %1813 = vmatmul.msk.f32.vlgmr.msra.gmra.mxu0 %vm650_vm1, %v712_v49 }
 0x134   : > { %v699_v51 = vsel %vm698_vm8, %v1864_v38, %v695_v50 }
 0x135   : > { %v701_v52 = vmul.f32 %v699_v51, %v667_v20 }
 0x137   : > { %v707_v53 = vmul.f32 %v1851_v41, %v701_v52 }
 0x139   : > { %v713_v54 = vadd.f32 %v1852_v45, %v707_v53 }
 0x13b   : > { %1814 = vmatmul.msk.f32.gmra.mxu0 %vm650_vm1, %v713_v54 }
 0x1b0   : > { %v745_v63 = vpop.f32.mrf.mxu0 }
 0x1b1   : > { %v2120_v1 = vadd.f32 %v1853_v61, %v745_v63 }
 0x1b3   : > { %753 = vst.msk [vmem:[#allocation3 + $0x8] sm:$0xff] %vm751_vm9, %v2120_v1  ;;  %v757_v11 = vmul.f32 %v756_v4, %v2120_v1 }
 0x1b8   : > { %v748_v6 = vpop.f32.mrf.mxu0 }
 0x1b9   : > { %v2126_v7 = vadd.f32 %v1853_v61, %v748_v6  ;;  %v1855_v61 = vld [vmem:[%s2332_s5] ss:$0 sm:$0xff] }
 0x1ba   : > { %v759_v9 = vld [vmem:[#allocation3 + $0x2] sm:$0xff] }
 0x1bb   : > { %v766_v10 = vld [vmem:[#allocation3 + $0x4] sm:$0xff]  ;;  %v762_v12 = vmul.f32 %v761_v5, %v759_v9  ;;  %754 = vst.msk [vmem:[#allocation3 + $0x10] sm:$0xff] %vm751_vm9, %v2126_v7  ;;  %v758_v23 = vmul.f32 %v756_v4, %v2126_v7 }
 0x1bc   : > { %v773_v14 = vld [vmem:[#allocation3 + $0x6] sm:$0xff]  ;;  %v769_v16 = vmul.f32 %v768_v8, %v766_v10 }
 0x1bd   : > { %v764_v15 = vadd.f32 %v762_v12, %v757_v11  ;;  %v776_v18 = vmul.f32 %v775_v13, %v773_v14 }
 0x1bf   : > { %v771_v17 = vadd.f32 %v769_v16, %v764_v15 }
 0x1c1   : > { %v778_v20 = vadd.f32 %v776_v18, %v771_v17 }
 0x1c2   : > { %v760_v21 = vld [vmem:[#allocation3 + $0xa] sm:$0xff] }
 0x1c3   : > { %v767_v22 = vld [vmem:[#allocation3 + $0xc] sm:$0xff]  ;;  %v763_v24 = vmul.f32 %v761_v5, %v760_v21  ;;  %v784_v25 = vadd.f32 %v1854_v19, %v778_v20 }
 0x1c4   : > { %v774_v26 = vld [vmem:[#allocation3 + $0xe] sm:$0xff]  ;;  %v770_v29 = vmul.f32 %v768_v8, %v767_v22 }
 0x1c5   : > { %v765_v27 = vadd.f32 %v763_v24, %v758_v23  ;;  %v1815_v28 = vmul.f32 -1.442695, %v784_v25  ;;  %v777_v31 = vmul.f32 %v775_v13, %v774_v26 }
 0x1c7   : > { %1865 = vpow2.f32 %v1815_v28  ;;  %v772_v30 = vadd.f32 %v770_v29, %v765_v27 }
 0x1c9   : > { %v779_v32 = vadd.f32 %v777_v31, %v772_v30  ;;  %v938_v30 = vlaneseq }
 0x1cb   : > { %v785_v33 = vadd.f32 %v1854_v19, %v779_v32  ;;  %v939_v31 = vshrl.u32 %v938_v30, 7 }
 0x1cd   : > { %v1866_v34 = vpop.eup %1865  ;;  %v1816_v35 = vmul.f32 -1.442695, %v785_v33  ;;  %1850 = vset.pattern.permute.xlu1 %v939_v31  ;;  %1849 = vset.pattern.permute.xlu0 %v939_v31 }
 0x1ce   : > { %v792_v36 = vadd.f32 1.0, %v1866_v34  ;;  %1848 = vset.pattern.permute.xlu2 %v939_v31 }
 0x1cf   : > { %1867 = vpow2.f32 %v1816_v35 }
 0x1d0   : > { %1869 = vrcp.f32 %v792_v36  ;;  %v805_v42 = vand.u32 2147483648, %v792_v36  ;;  %v803_v44 = vand.u32 2147483647, %v792_v36  ;;  %vm799_vm11 = vweird.f32 %v792_v36 }
 0x1d2   : > { %v806_v47 = vor.u32 1.1754944e-38, %v805_v42  ;;  %vm804_vm13 = vcmp.eq.f32.partialorder %v803_v44, 8.507059e+37 }
 0x1d5   : > { %v1868_v37 = vpop.eup %1867 }
 0x1d6   : > { %v1870_v38 = vpop.eup %1869  ;;  %v793_v39 = vadd.f32 1.0, %v1868_v37 }
 0x1d7   : > { %v795_v40 = vmul.f32 %v1870_v38, %v792_v36  ;;  %vm800_vm10 = vweird.f32 %v1870_v38 }
 0x1d8   : > { %1871 = vrcp.f32 %v793_v39  ;;  %vm801_vm12 = vmor %vm799_vm11, %vm800_vm10  ;;  %v820_v53 = vand.u32 2147483648, %v793_v39  ;;  %v818_v55 = vand.u32 2147483647, %v793_v39  ;;  %vm814_vm15 = vweird.f32 %v793_v39 }
 0x1d9   : > { %v796_v41 = vsub.f32 1.0, %v795_v40 }
 0x1da   : > { %v821_v57 = vor.u32 1.1754944e-38, %v820_v53  ;;  %vm819_vm2 = vcmp.eq.f32.partialorder %v818_v55, 8.507059e+37 }
 0x1db   : > { %v797_v43 = vmul.f32 %v1870_v38, %v796_v41 }
 0x1dd   : > { %v798_v45 = vadd.f32 %v1870_v38, %v797_v43 }
 0x1de   : > { %v1872_v46 = vpop.eup %1871 }
 0x1df   : > { %v802_v48 = vsel %vm801_vm12, %v1870_v38, %v798_v45  ;;  %v810_v49 = vmul.f32 %v1872_v46, %v793_v39  ;;  %vm815_vm14 = vweird.f32 %v1872_v46 }
 0x1e0   : > { %v807_v50 = vsel %vm804_vm13, %v806_v47, %v802_v48  ;;  %vm816_vm0 = vmor %vm814_vm15, %vm815_vm14 }
 0x1e1   : > { %v2137_v51 = vmul.f32 %v807_v50, %v784_v25  ;;  %v811_v52 = vsub.f32 1.0, %v810_v49 }
 0x1e3   : > { %1817 = vmatmul.msk.f32.vlgmr.msra.gmra.mxu1 %vm751_vm9, %v2137_v51  ;;  %v812_v54 = vmul.f32 %v1872_v46, %v811_v52 }
 0x1e5   : > { %v813_v56 = vadd.f32 %v1872_v46, %v812_v54 }
 0x1e7   : > { %v817_v58 = vsel %vm816_vm0, %v1872_v46, %v813_v56 }
 0x1e8   : > { %v822_v59 = vsel %vm819_vm2, %v821_v57, %v817_v58  ;;  %v1819_v58 = vmul.f32 -1.442695, %v2120_v1  ;;  %vm995_vm2 = vcmask 1041409  }
 0x1e9   : > { %v2141_v60 = vmul.f32 %v822_v59, %v785_v33 }
 0x1eb   : > { %1818 = vmatmul.msk.f32.vlgmr.msra.gmra.mxu3 %vm751_vm9, %v2141_v60 }
 0x260   : > { %v861_v62 = vpop.f32.mrf.mxu1 }
 0x261   : > { %v862_v63 = vadd.f32 %v1855_v61, %v861_v62 }
 0x263   : > { %v869_v0 = vmin.f32 %v862_v63, 20.0  ;;  %912 = vrot.lane.b32.xlu0 %v862_v63, %s1933_s30  ;;  %903 = vrot.lane.b32.xlu2 %v862_v63, %s1934_s21  ;;  %vm867_vm4 = vcmp.gt.f32.partialorder %v862_v63, 20.0 }
 0x265   : > { %v871_v2 = vmul.f32 1.442695, %v869_v0 }
 0x267   : > { %1873 = vpow2.f32 %v871_v2 }
 0x26d   : > { %v1874_v3 = vpop.eup %1873 }
 0x26e   : > { %v875_v4 = vadd.f32 1.0, %v1874_v3  ;;  %v864_v5 = vpop.f32.mrf.mxu3  ;;  %v878_v6 = vmul.f32 -0.5, %v1874_v3  ;;  %v881_v12 = vand.u32 2147483647, %v1874_v3 }
 0x26f   : > { %v865_v8 = vadd.f32 %v1855_v61, %v864_v5 }
 0x270   : > { %1875 = vlog2.f32 %v875_v4  ;;  %v879_v10 = vadd.f32 1.0, %v878_v6  ;;  %vm882_vm3 = vcmp.lt.f32.partialorder %v881_v12, 0.0004427343 }
 0x271   : > { %v870_v9 = vmin.f32 %v865_v8, 20.0  ;;  %914 = vrot.lane.b32.xlu1 %v865_v8, %s1933_s30  ;;  %905 = vrot.lane.b32.xlu2 %v865_v8, %s1934_s21  ;;  %vm868_vm6 = vcmp.gt.f32.partialorder %v865_v8, 20.0 }
 0x272   : > { %v880_v15 = vmul.f32 %v1874_v3, %v879_v10 }
 0x273   : > { %v873_v11 = vmul.f32 1.442695, %v870_v9 }
 0x275   : > { %1877 = vpow2.f32 %v873_v11  ;;  %v1820_v11 = vmul.f32 -1.442695, %v2126_v7 }
 0x276   : > { %v1876_v13 = vpop.eup %1875 }
 0x277   : > { %v877_v14 = vmul.f32 0.6931472, %v1876_v13 }
 0x279   : > { %v883_v16 = vsel %vm882_vm3, %v880_v15, %v877_v14  ;;  %vm998_vm3 = vcmask 517120  }
 0x27a   : > { %v893_v17 = vsel %vm867_vm4, %v862_v63, %v883_v16 }
 0x27b   : > { %v1878_v18 = vpop.eup %1877  ;;  %895 = vst.msk [vmem:[#allocation4] sm:$0xff] %vm751_vm9, %v893_v17  ;;  %v897_v19 = vmul.f32 %v893_v17, %v2137_v51 }
 0x27c   : > { %v884_v20 = vadd.f32 1.0, %v1878_v18  ;;  %v887_v21 = vmul.f32 -0.5, %v1878_v18  ;;  %v890_v23 = vand.u32 2147483647, %v1878_v18 }
 0x27d   : > { %899 = vst.msk [vmem:[#allocation5] sm:$0xff] %vm751_vm9, %v897_v19 }
 0x27e   : > { %1879 = vlog2.f32 %v884_v20  ;;  %v888_v22 = vadd.f32 1.0, %v887_v21  ;;  %vm891_vm5 = vcmp.lt.f32.partialorder %v890_v23, 0.0004427343 }
 0x27f   : > { %1881 = vpow2.f32 %v1819_v58 }
 0x280   : > { %v889_v26 = vmul.f32 %v1878_v18, %v888_v22 }
 0x284   : > { %v1880_v24 = vpop.eup %1879 }
 0x285   : > { %v886_v25 = vmul.f32 0.6931472, %v1880_v24  ;;  %v1882_v4 = vpop.eup %1881 }
 0x286   : > { %v1555_v5 = vadd.f32 1.0, %v1882_v4 }
 0x287   : > { %v892_v27 = vsel %vm891_vm5, %v889_v26, %v886_v25 }
 0x288   : > { %v894_v28 = vsel %vm868_vm6, %v865_v8, %v892_v27  ;;  %1883 = vrcp.f32 %v1555_v5  ;;  %v1568_v30 = vand.u32 2147483648, %v1555_v5  ;;  %vm1562_vm10 = vweird.f32 %v1555_v5 }
 0x289   : > { %896 = vst.msk [vmem:[#allocation4 + $0x8] sm:$0xff] %vm751_vm9, %v894_v28  ;;  %v898_v29 = vmul.f32 %v894_v28, %v2141_v60  ;;  %1885 = vpow2.f32 %v1820_v11 }
 0x28b   : > { %900 = vst.msk [vmem:[#allocation5 + $0x8] sm:$0xff] %vm751_vm9, %v898_v29 }
 0x28e   : > { %v1884_v14 = vpop.eup %1883 }
 0x28f   : > { %v1558_v18 = vmul.f32 %v1884_v14, %v1555_v5  ;;  %v1886_v19 = vpop.eup %1885  ;;  %vm1563_vm8 = vweird.f32 %v1884_v14 }
 0x290   : > { %v1556_v22 = vadd.f32 1.0, %v1886_v19  ;;  %vm1564_vm11 = vmor %vm1562_vm10, %vm1563_vm8 }
 0x291   : > { %v1559_v23 = vsub.f32 1.0, %v1558_v18 }
 0x292   : > { %1887 = vrcp.f32 %v1556_v22  ;;  %vm1577_vm14 = vweird.f32 %v1556_v22 }
 0x293   : > { %v1560_v27 = vmul.f32 %v1884_v14, %v1559_v23  ;;  %v1001_v23 = vld [vmem:[#allocation5 + $0x2] sm:$0x3] }
 0x295   : > { %v1561_v29 = vadd.f32 %v1884_v14, %v1560_v27 }
 0x298   : > { %v1888_v31 = vpop.eup %1887 }
 0x299   : > { %vm1578_vm13 = vweird.f32 %v1888_v31 }
 0x29a   : > { %vm1579_vm15 = vmor %vm1577_vm14, %vm1578_vm13 }
 0x2bd   : > { %v904_v32 = vpop.permute.xlu2 %903 }
 0x2be   : > { %910 = vst.msk [vmem:[#allocation6] sm:$0xff] %vm909_vm7, %v904_v32 }
 0x2c5   : > { %v1002_v33 = vld [vmem:[#allocation6 + $0x2] sm:$0x3]  ;;  %v1079_v34 = vld [vmem:[#allocation6 + $0x4] sm:$0x3]  ;;  %v923_v35 = vld [vmem:[#allocation6] sm:$0x3] }
 0x2c6   : > { %v1023_v36 = vperm.slane %v1002_v33, 1  ;;  %v1100_v37 = vperm.slane %v1079_v34, 1  ;;  %v937_v38 = vperm.slane %v923_v35, 0  ;;  %v1156_v40 = vld [vmem:[#allocation6 + $0x6] sm:$0x3]  ;;  %v944_v42 = vperm.slane %v923_v35, 1 }
 0x2c7   : > { %v1177_v41 = vperm.slane %v1156_v40, 1  ;;  %v1016_v44 = vperm.slane %v1002_v33, 0  ;;  %v1093_v49 = vperm.slane %v1079_v34, 0  ;;  %v1170_v55 = vperm.slane %v1156_v40, 0 }
 0x2c8   : > { %1028 = vperm.xlu0 %1849, %v1023_v36   ;;  %1105 = vperm.xlu1 %1850, %v1100_v37   ;;  %v1566_v34 = vand.u32 2147483647, %v1555_v5  ;;  %v1565_v36 = vsel %vm1564_vm11, %v1884_v14, %v1561_v29  ;;  %v1569_v37 = vor.u32 1.1754944e-38, %v1568_v30  ;;  %v1077_v5 = vld [vmem:[#allocation4 + $0x4] sm:$0x3] }
 0x2c9   : > { %942 = vperm.xlu2 %1848, %v937_v38   ;;  %v1573_v38 = vmul.f32 %v1888_v31, %v1556_v22  ;;  %v1083_v11 = vperm.slane %v1077_v5, 0 }
 0x2ca   : > { %vm1567_vm12 = vcmp.eq.f32.partialorder %v1566_v34, 8.507059e+37  ;;  %v1032_v34 = vperm.slane %v1001_v23, 0 }
 0x2cb   : > { %v906_v39 = vpop.permute.xlu2 %905  ;;  %v1574_v40 = vsub.f32 1.0, %v1573_v38 }
 0x2cc   : > { %911 = vst.msk [vmem:[#allocation6 + $0x8] sm:$0xff] %vm909_vm7, %v906_v39  ;;  %v1570_v39 = vsel %vm1567_vm12, %v1569_v37, %v1565_v36 }
 0x2d0   : > { %1182 = vperm.xlu1 %1850, %v1177_v41   ;;  %v1587_v41 = vmul.f32 %v1570_v39, %v2120_v1 }
 0x2d1   : > { %949 = vperm.xlu2 %1848, %v944_v42  }
 0x2d3   : > { %v1233_v56 = vld [vmem:[#allocation6 + $0x8] sm:$0x3]  ;;  %v1310_v63 = vld [vmem:[#allocation6 + $0xa] sm:$0x3]  ;;  %v1387_v6 = vld [vmem:[#allocation6 + $0xc] sm:$0x3] }
 0x2d4   : > { %v1247_v59 = vperm.slane %v1233_v56, 0  ;;  %v1331_v0 = vperm.slane %v1310_v63, 1  ;;  %v1324_v2 = vperm.slane %v1310_v63, 0  ;;  %v1464_v8 = vld [vmem:[#allocation6 + $0xe] sm:$0x3]  ;;  %v1401_v9 = vperm.slane %v1387_v6, 0 }
 0x2d5   : > { %v913_v43 = vpop.permute.xlu0 %912  ;;  %v1478_v10 = vperm.slane %v1464_v8, 0  ;;  %v1485_v15 = vperm.slane %v1464_v8, 1  ;;  %v1254_v17 = vperm.slane %v1233_v56, 1  ;;  %v1408_v26 = vperm.slane %v1387_v6, 1 }
 0x2d6   : > { %918 = vst.msk [vmem:[#allocation7] sm:$0xff] %vm909_vm7, %v913_v43  ;;  %v1575_v43 = vmul.f32 %v1888_v31, %v1574_v40  ;;  %v1078_v40 = vld [vmem:[#allocation5 + $0x4] sm:$0x3] }
 0x2d9   : > { %1021 = vperm.xlu2 %1848, %v1016_v44  }
 0x2dd   : > { %v1003_v45 = vld [vmem:[#allocation7 + $0x2] sm:$0x3]  ;;  %v924_v46 = vld [vmem:[#allocation7] sm:$0x3]  ;;  %v1080_v52 = vld [vmem:[#allocation7 + $0x4] sm:$0x3] }
 0x2de   : > { %v1042_v47 = vperm.slane %v1003_v45, 0  ;;  %v970_v48 = vperm.slane %v924_v46, 1  ;;  %v1126_v53 = vperm.slane %v1080_v52, 1  ;;  %v1119_v54 = vperm.slane %v1080_v52, 0  ;;  %v1157_v57 = vld [vmem:[#allocation7 + $0x6] sm:$0x3] }
 0x2df   : > { %v1203_v61 = vperm.slane %v1157_v57, 1  ;;  %v963_v62 = vperm.slane %v924_v46, 0  ;;  %v1049_v3 = vperm.slane %v1003_v45, 1  ;;  %v1196_v12 = vperm.slane %v1157_v57, 0  ;;  %v2169_v57 = vld [vmem:[%s2062_s29] sm:$0xff] }
 0x2e0   : > { %1047 = vperm.xlu0 %1849, %v1042_v47   ;;  %975 = vperm.xlu1 %1850, %v970_v48   ;;  %v1576_v45 = vadd.f32 %v1888_v31, %v1575_v43  ;;  %v1583_v46 = vand.u32 2147483648, %v1556_v22  ;;  %v1581_v48 = vand.u32 2147483647, %v1556_v22 }
 0x2e1   : > { %1098 = vperm.xlu2 %1848, %v1093_v49  }
 0x2e2   : > { %v1580_v49 = vsel %vm1579_vm15, %v1888_v31, %v1576_v45  ;;  %vm1582_vm0 = vcmp.eq.f32.partialorder %v1581_v48, 8.507059e+37  ;;  %v1155_v48 = vld [vmem:[#allocation5 + $0x6] sm:$0x3] }
 0x2e3   : > { %v915_v50 = vpop.permute.xlu1 %914 }
 0x2e4   : > { %919 = vst.msk [vmem:[#allocation7 + $0x8] sm:$0xff] %vm909_vm7, %v915_v50  ;;  %v1584_v50 = vor.u32 1.1754944e-38, %v1583_v46 }
 0x2e6   : > { %v1585_v1 = vsel %vm1582_vm0, %v1584_v50, %v1580_v49 }
 0x2e8   : > { %1131 = vperm.xlu0 %1849, %v1126_v53   ;;  %1124 = vperm.xlu1 %1850, %v1119_v54   ;;  %v921_v53 = vld [vmem:[#allocation4] sm:$0x3]  ;;  %v1588_v54 = vmul.f32 %v1585_v1, %v2126_v7  ;;  %v1231_v1 = vld [vmem:[#allocation4 + $0x8] sm:$0x3] }
 0x2e9   : > { %1175 = vperm.xlu2 %1848, %v1170_v55   ;;  %v926_v55 = vrot.slane %v921_v53, 1  ;;  %v927_v56 = vperm.slane %v921_v53, 0  ;;  %v1108_v53 = vrot.slane %v1078_v40, 1 }
 0x2eb   : > { %v1234_v13 = vld [vmem:[#allocation7 + $0x8] sm:$0x3]  ;;  %v1311_v20 = vld [vmem:[#allocation7 + $0xa] sm:$0x3]  ;;  %v1388_v21 = vld [vmem:[#allocation7 + $0xc] sm:$0x3] }
 0x2ec   : > { %v1280_v16 = vperm.slane %v1234_v13, 1  ;;  %v1350_v24 = vperm.slane %v1311_v20, 0  ;;  %v1427_v25 = vperm.slane %v1388_v21, 0  ;;  %v1465_v28 = vld [vmem:[#allocation7 + $0xe] sm:$0x3]  ;;  %v1434_v32 = vperm.slane %v1388_v21, 1 }
 0x2ed   : > { %v1511_v33 = vperm.slane %v1465_v28, 1  ;;  %v1273_v35 = vperm.slane %v1234_v13, 0  ;;  %v1357_v42 = vperm.slane %v1311_v20, 1  ;;  %v1504_v47 = vperm.slane %v1465_v28, 0 }
 0x2ee   : > { %v1087_v21 = vmul.f32 %v1083_v11, %v2169_v57 }
 0x2f0   : > { %1252 = vperm.xlu0 %1849, %v1247_v59   ;;  %1208 = vperm.xlu1 %1850, %v1203_v61   ;;  %v928_v59 = vperm.slane %v926_v55, 0  ;;  %v931_v61 = vmul.f32 %v927_v56, %v2169_v57 }
 0x2f1   : > { %968 = vperm.xlu2 %1848, %v963_v62   ;;  %v1000_v62 = vld [vmem:[#allocation4 + $0x2] sm:$0x3] }
 0x2f2   : > { %v932_v63 = vmul.f32 %v928_v59, %v2169_v57 }
 0x2f4   : > { %v935_v7 = vmul.f32 1.442695, %v932_v63 }
 0x2f8   : > { %1336 = vperm.xlu0 %1849, %v1331_v0   ;;  %1329 = vperm.xlu1 %1850, %v1324_v2   ;;  %v1005_v0 = vrot.slane %v1000_v62, 1  ;;  %v933_v2 = vmul.f32 1.442695, %v931_v61 }
 0x2f9   : > { %1054 = vperm.xlu2 %1848, %v1049_v3   ;;  %v1006_v3 = vperm.slane %v1000_v62, 0  ;;  %v1185_v62 = vrot.slane %v1155_v48, 1 }
 0x2fa   : > { %v1007_v6 = vperm.slane %v1005_v0, 0  ;;  %1889 = vpow2.f32 %v933_v2  ;;  %v1237_v2 = vperm.slane %v1231_v1, 0 }
 0x2fb   : > { %v1010_v8 = vmul.f32 %v1006_v3, %v2169_v57  ;;  %1891 = vpow2.f32 %v935_v7 }
 0x2fc   : > { %v1011_v13 = vmul.f32 %v1007_v6, %v2169_v57 }
 0x300   : > { %1406 = vperm.xlu0 %1849, %v1401_v9   ;;  %1483 = vperm.xlu1 %1850, %v1478_v10   ;;  %v922_v9 = vld [vmem:[#allocation5] sm:$0x3]  ;;  %v1082_v10 = vrot.slane %v1077_v5, 1  ;;  %v1890_v19 = vpop.eup %1889 }
 0x301   : > { %1201 = vperm.xlu2 %1848, %v1196_v12   ;;  %v952_v14 = vrot.slane %v922_v9, 1  ;;  %v1892_v28 = vpop.eup %1891  ;;  %v959_v29 = vmul.f32 0.0, %v1890_v19  ;;  %v1241_v19 = vmul.f32 %v1237_v2, %v2169_v57 }
 0x302   : > { %v1084_v18 = vperm.slane %v1082_v10, 0  ;;  %v960_v37 = vmul.f32 0.0, %v1892_v28  ;;  %v1186_v10 = vperm.slane %v1155_v48, 0  ;;  %v1236_v28 = vrot.slane %v1231_v1, 1 }
 0x304   : > { %v1088_v30 = vmul.f32 %v1084_v18, %v2169_v57 }
 0x306   : > { %v1091_v43 = vmul.f32 1.442695, %v1088_v30 }
 0x308   : > { %1490 = vperm.xlu0 %1849, %v1485_v15   ;;  %1285 = vperm.xlu1 %1850, %v1280_v16   ;;  %v1012_v15 = vmul.f32 1.442695, %v1010_v8  ;;  %v1154_v16 = vld [vmem:[#allocation4 + $0x6] sm:$0x3] }
 0x309   : > { %1259 = vperm.xlu2 %1848, %v1254_v17   ;;  %v953_v17 = vperm.slane %v922_v9, 0  ;;  %v1160_v27 = vperm.slane %v1154_v16, 0  ;;  %v1110_v9 = vperm.slane %v1108_v53, 0 }
 0x30a   : > { %1893 = vpow2.f32 %v1012_v15  ;;  %v1187_v15 = vperm.slane %v1185_v62, 0 }
 0x30b   : > { %v1164_v38 = vmul.f32 %v1160_v27, %v2169_v57 }
 0x30d   : > { %v1166_v55 = vmul.f32 1.442695, %v1164_v38 }
 0x310   : > { %1355 = vperm.xlu0 %1849, %v1350_v24   ;;  %1432 = vperm.xlu1 %1850, %v1427_v25   ;;  %v1014_v24 = vmul.f32 1.442695, %v1011_v13  ;;  %v1159_v25 = vrot.slane %v1154_v16, 1 }
 0x311   : > { %1413 = vperm.xlu2 %1848, %v1408_v26   ;;  %v954_v26 = vperm.slane %v952_v14, 0 }
 0x312   : > { %1895 = vpow2.f32 %v1014_v24  ;;  %v1161_v36 = vperm.slane %v1159_v25, 0  ;;  %v2190_v24 = vld [vmem:[#allocation4 + $0xa] sm:$0x3] }
 0x318   : > { %1439 = vperm.xlu0 %1849, %v1434_v32   ;;  %1516 = vperm.xlu1 %1850, %v1511_v33   ;;  %v1031_v32 = vrot.slane %v1001_v23, 1  ;;  %v1089_v33 = vmul.f32 1.442695, %v1087_v21 }
 0x319   : > { %1278 = vperm.xlu2 %1848, %v1273_v35  }
 0x31a   : > { %v1033_v45 = vperm.slane %v1031_v32, 0  ;;  %1897 = vpow2.f32 %v1089_v33 }
 0x31b   : > { %1899 = vpow2.f32 %v1091_v43 }
 0x31c   : > { %1901 = vpow2.f32 %v1166_v55 }
 0x320   : > { %1591 = vrot.lane.b32.xlu0 %v1587_v41, %s1934_s21 }
 0x321   : > { %1362 = vperm.xlu2 %1848, %v1357_v42  }
 0x323   : > { %v943_v44 = vpop.permute.xlu2 %942 }
 0x324   : > { %v957_v22 = vmul.f32 %v953_v17, %v943_v44  ;;  %v1894_v44 = vpop.eup %1893 }
 0x325   : > { %v1896_v56 = vpop.eup %1895 }
 0x326   : > { %v961_v35 = vadd.f32 %v959_v29, %v957_v22  ;;  %v1898_v7 = vpop.eup %1897 }
 0x327   : > { %v1900_v21 = vpop.eup %1899 }
 0x328   : > { %v1038_v50 = vmul.f32 %v1894_v44, %v961_v35  ;;  %v1902_v33 = vpop.eup %1901 }
 0x329   : > { %1509 = vperm.xlu2 %1848, %v1504_v47  }
 0x32b   : > { %v950_v52 = vpop.permute.xlu2 %949 }
 0x32c   : > { %v958_v31 = vmul.f32 %v954_v26, %v950_v52  ;;  %v1165_v52 = vmul.f32 %v1161_v36, %v2169_v57  ;;  %v2197_v36 = vmul.f32 1.442695, %v1241_v19 }
 0x32e   : > { %v962_v47 = vadd.f32 %v960_v37, %v958_v31  ;;  %v1168_v5 = vmul.f32 1.442695, %v1165_v52  ;;  %v1314_v37 = vperm.slane %v2190_v24, 0 }
 0x330   : > { %v1039_v0 = vmul.f32 %v1896_v56, %v962_v47  ;;  %1903 = vpow2.f32 %v1168_v5 }
 0x331   : > { %1593 = vrot.lane.b32.xlu2 %v1588_v54, %s1934_s21  ;;  %1905 = vpow2.f32 %v2197_v36 }
 0x333   : > { %v1022_v58 = vpop.permute.xlu2 %1021 }
 0x334   : > { %v1036_v39 = vmul.f32 %v1032_v34, %v1022_v58  ;;  %v1109_v58 = vperm.slane %v1078_v40, 0 }
 0x336   : > { %v1040_v61 = vadd.f32 %v1038_v50, %v1036_v39 }
 0x338   : > { %v1115_v14 = vmul.f32 %v1898_v7, %v1040_v61 }
 0x33a   : > { %v2176_v12 = vpop.permute.xlu1 %1105  ;;  %v1029_v41 = vpop.permute.xlu0 %1028 }
 0x33b   : > { %v2173_v4 = vpop.permute.xlu2 %1098  ;;  %v1037_v54 = vmul.f32 %v1033_v45, %v1029_v41  ;;  %v1114_v34 = vmul.f32 %v1110_v9, %v2176_v12  ;;  %v1238_v45 = vperm.slane %v1236_v28, 0 }
 0x33c   : > { %v1113_v3 = vmul.f32 %v1109_v58, %v2173_v4 }
 0x33d   : > { %v1041_v8 = vadd.f32 %v1039_v0, %v1037_v54 }
 0x33e   : > { %v1117_v4 = vadd.f32 %v1115_v14, %v1113_v3 }
 0x33f   : > { %v1116_v27 = vmul.f32 %v1900_v21, %v1041_v8 }
 0x340   : > { %v1192_v41 = vmul.f32 %v1902_v33, %v1117_v4 }
 0x341   : > { %v1118_v44 = vadd.f32 %v1116_v27, %v1114_v34 }
 0x342   : > { %v2184_v42 = vpop.permute.xlu1 %1182 }
 0x343   : > { %v2179_v20 = vpop.permute.xlu2 %1175  ;;  %v1191_v52 = vmul.f32 %v1187_v15, %v2184_v42 }
 0x344   : > { %v1190_v29 = vmul.f32 %v1186_v10, %v2179_v20  ;;  %v1313_v20 = vrot.slane %v2190_v24, 1  ;;  %v1385_v10 = vld [vmem:[#allocation4 + $0xc] sm:$0x3]  ;;  %v1318_v24 = vmul.f32 %v1314_v37, %v2169_v57 }
 0x346   : > { %v2201_v12 = vadd.f32 %v1192_v41, %v1190_v29  ;;  %v1315_v37 = vperm.slane %v1313_v20, 0  ;;  %v1309_v20 = vld [vmem:[#allocation5 + $0xa] sm:$0x3] }
 0x34b   : > { %v969_v46 = vpop.permute.xlu2 %968 }
 0x34c   : > { %v977_v49 = vmul.f32 %v969_v46, %v961_v35  ;;  %v1904_v46 = vpop.eup %1903 }
 0x34d   : > { %v1193_v2 = vmul.f32 %v1904_v46, %v1118_v44 }
 0x34e   : > { %v979_v59 = vsel %vm751_vm9, %v977_v49, 0.0 }
 0x34f   : > { %v980_v63 = vrot.slane %v979_v59, 4  ;;  %v2208_v19 = vadd.f32 %v1193_v2, %v1191_v52 }
 0x351   : > { %v981_v6 = vadd.f32 %v980_v63, %v979_v59 }
 0x352   : > { %v976_v11 = vpop.permute.xlu1 %975  ;;  %v1048_v13 = vpop.permute.xlu0 %1047 }
 0x353   : > { %v978_v16 = vmul.f32 %v976_v11, %v962_v47  ;;  %v1055_v17 = vpop.permute.xlu2 %1054  ;;  %v1056_v18 = vmul.f32 %v1048_v13, %v1040_v61  ;;  %v982_v22 = vrot.slane %v981_v6, 2 }
 0x354   : > { %v1057_v23 = vmul.f32 %v1055_v17, %v1041_v8 }
 0x355   : > { %v986_v25 = vsel %vm751_vm9, %v978_v16, 0.0  ;;  %v1058_v26 = vsel %vm751_vm9, %v1056_v18, 0.0  ;;  %v983_v38 = vadd.f32 %v982_v22, %v981_v6 }
 0x356   : > { %v987_v30 = vrot.slane %v986_v25, 4  ;;  %v1065_v31 = vsel %vm751_vm9, %v1057_v23, 0.0  ;;  %v1059_v32 = vrot.slane %v1058_v26, 4 }
 0x357   : > { %v1066_v35 = vrot.slane %v1065_v31, 4  ;;  %v984_v56 = vrot.slane %v983_v38, 1 }
 0x358   : > { %v988_v39 = vadd.f32 %v987_v30, %v986_v25  ;;  %v1060_v40 = vadd.f32 %v1059_v32, %v1058_v26  ;;  %v1391_v25 = vperm.slane %v1385_v10, 0  ;;  %v1242_v30 = vmul.f32 %v1238_v45, %v2169_v57  ;;  %v1462_v45 = vld [vmem:[#allocation4 + $0xe] sm:$0x3] }
 0x359   : > { %v1067_v43 = vadd.f32 %v1066_v35, %v1065_v31  ;;  %v985_v11 = vadd.f32 %v984_v56, %v983_v38  ;;  %v1232_v35 = vld [vmem:[#allocation5 + $0x8] sm:$0x3] }
 0x35a   : > { %v989_v47 = vrot.slane %v988_v39, 2  ;;  %v1061_v48 = vrot.slane %v1060_v40, 2  ;;  %v1125_v49 = vpop.permute.xlu1 %1124  ;;  %v1132_v50 = vpop.permute.xlu0 %1131  ;;  %v1395_v46 = vmul.f32 %v1391_v25, %v2169_v57 }
 0x35b   : > { %v1068_v1 = vrot.slane %v1067_v43, 2  ;;  %v1133_v53 = vmul.f32 %v1125_v49, %v1117_v4  ;;  %v1202_v54 = vpop.permute.xlu2 %1201  ;;  %v1134_v55 = vmul.f32 %v1132_v50, %v1118_v44  ;;  %v1390_v44 = vrot.slane %v1385_v10, 1  ;;  %v2226_v10 = vld [vmem:[#allocation5 + $0xc] sm:$0x3] }
 0x35c   : > { %v990_v58 = vadd.f32 %v989_v47, %v988_v39  ;;  %v1062_v59 = vadd.f32 %v1061_v48, %v1060_v40  ;;  %v1210_v61 = vmul.f32 %v1202_v54, %v2201_v12  ;;  %v1320_v40 = vmul.f32 1.442695, %v1318_v24 }
 0x35d   : > { %v1069_v62 = vadd.f32 %v1068_v1, %v1067_v43  ;;  %v1135_v63 = vsel %vm751_vm9, %v1133_v53, 0.0  ;;  %v1142_v0 = vsel %vm751_vm9, %v1134_v55, 0.0  ;;  %v1245_v43 = vmul.f32 1.442695, %v1242_v30 }
 0x35e   : > { %v991_v3 = vrot.slane %v990_v58, 1  ;;  %v1063_v5 = vrot.slane %v1062_v59, 1  ;;  %v1136_v7 = vrot.slane %v1135_v63, 4  ;;  %v1212_v42 = vsel %vm751_vm9, %v1210_v61, 0.0 }
 0x35f   : > { %v1070_v6 = vrot.slane %v1069_v62, 1  ;;  %v1213_v8 = vrot.slane %v1212_v42, 4  ;;  %v1143_v9 = vrot.slane %v1142_v0, 4  ;;  %v1263_v50 = vperm.slane %v1232_v35, 0 }
 0x360   : > { %v992_v13 = vadd.f32 %v991_v3, %v990_v58  ;;  %v1064_v14 = vadd.f32 %v1063_v5, %v1062_v59  ;;  %v1137_v15 = vadd.f32 %v1136_v7, %v1135_v63  ;;  %v1262_v1 = vrot.slane %v1232_v35, 1  ;;  %v1906_v59 = vpop.eup %1905 }
 0x361   : > { %v1071_v16 = vadd.f32 %v1070_v6, %v1069_v62  ;;  %v1214_v17 = vadd.f32 %v1213_v8, %v1212_v42  ;;  %v1144_v18 = vadd.f32 %v1143_v9, %v1142_v0  ;;  %v1319_v53 = vmul.f32 %v1315_v37, %v2169_v57 }
 0x362   : > { %v996_v21 = vsel %vm995_vm2, %v992_v13, %v985_v11  ;;  %v1138_v22 = vrot.slane %v1137_v15, 2  ;;  %v1209_v23 = vpop.permute.xlu1 %1208  ;;  %v1253_v4 = vpop.permute.xlu0 %1252  ;;  %1907 = vpow2.f32 %v1320_v40  ;;  %v1468_v58 = vperm.slane %v1462_v45, 0 }
 0x363   : > { %999 = vst.msk [vmem:[#allocation8] sm:$0x3] %vm998_vm3, %v996_v21  ;;  %v1074_v26 = vsel %vm995_vm2, %v1071_v16, %v1064_v14  ;;  %v1145_v27 = vrot.slane %v1144_v18, 2  ;;  %v1211_v28 = vmul.f32 %v1209_v23, %v2208_v19  ;;  %v1260_v29 = vpop.permute.xlu2 %1259  ;;  %v1215_v32 = vrot.slane %v1214_v17, 2 }
 0x364   : > { %1076 = vst.msk [vmem:[#allocation8 + $0x2] sm:$0x3] %vm998_vm3, %v1074_v26  ;;  %v1139_v31 = vadd.f32 %v1138_v22, %v1137_v15  ;;  %v1267_v36 = vmul.f32 %v1263_v50, %v1253_v4  ;;  %1909 = vpow2.f32 %v1245_v43  ;;  %v1392_v63 = vperm.slane %v1390_v44, 0  ;;  %v1606_v22 = vld [vmem:[%s2071_s1 + $0x38] sm:$0xff]  ;;  %v1603_v44 = vld [vmem:[%s2071_s1 + $0x20] sm:$0xff] }
 0x365   : > { %v1146_v33 = vadd.f32 %v1145_v27, %v1144_v18  ;;  %v1219_v34 = vsel %vm751_vm9, %v1211_v28, 0.0  ;;  %v1216_v48 = vadd.f32 %v1215_v32, %v1214_v17  ;;  %v1397_v0 = vmul.f32 1.442695, %v1395_v46  ;;  %1625 = vmatpush.msra.mxu2 %v1606_v22  ;;  %v1602_v50 = vld [vmem:[%s2071_s1 + $0x18] sm:$0xff] }
 0x366   : > { %v1140_v38 = vrot.slane %v1139_v31, 1  ;;  %v1220_v39 = vrot.slane %v1219_v34, 4  ;;  %v1269_v5 = vmul.f32 %v1906_v59, %v2201_v12  ;;  %v1340_v7 = vperm.slane %v1309_v20, 0 }
 0x367   : > { %v1147_v41 = vrot.slane %v1146_v33, 1  ;;  %v1217_v2 = vrot.slane %v1216_v48, 1  ;;  %v1322_v42 = vmul.f32 1.442695, %v1319_v53  ;;  %v1264_v8 = vperm.slane %v1262_v1, 0 }
 0x368   : > { %v1141_v47 = vadd.f32 %v1140_v38, %v1139_v31  ;;  %v1221_v49 = vadd.f32 %v1220_v39, %v1219_v34  ;;  %v1271_v9 = vadd.f32 %v1269_v5, %v1267_v36  ;;  %v1339_v11 = vrot.slane %v1309_v20, 1  ;;  %v1908_v16 = vpop.eup %1907  ;;  %v1605_v31 = vld [vmem:[%s2071_s1 + $0x30] sm:$0xff]  ;;  %v1463_v1 = vld [vmem:[#allocation5 + $0xe] sm:$0x3] }
 0x369   : > { %v1148_v52 = vadd.f32 %v1147_v41, %v1146_v33  ;;  %v1396_v13 = vmul.f32 %v1392_v63, %v2169_v57  ;;  %1911 = vpow2.f32 %v1397_v0  ;;  %v1472_v14 = vmul.f32 %v1468_v58, %v2169_v57  ;;  %1626 = vmatpush.msra.mxu2 %v1605_v31  ;;  %v1604_v33 = vld [vmem:[%s2071_s1 + $0x28] sm:$0xff] }
 0x36a   : > { %v1222_v54 = vrot.slane %v1221_v49, 2  ;;  %v1330_v55 = vpop.permute.xlu1 %1329  ;;  %v1337_v56 = vpop.permute.xlu0 %1336  ;;  %v1467_v15 = vrot.slane %v1462_v45, 1  ;;  %v1218_v17 = vadd.f32 %v1217_v2, %v1216_v48  ;;  %v1268_v12 = vmul.f32 %v1264_v8, %v1260_v29  ;;  %v1599_v2 = vld [vmem:[%s2071_s1] sm:$0xff] }
 0x36b   : > { %v1151_v61 = vsel %vm995_vm2, %v1148_v52, %v1141_v47  ;;  %v2222_v62 = vpop.permute.xlu2 %1413  ;;  %v1344_v21 = vmul.f32 %v1340_v7, %v1330_v55  ;;  %v1910_v23 = vpop.eup %1909  ;;  %v1417_v4 = vperm.slane %v2226_v10, 0  ;;  %1913 = vpow2.f32 %v1322_v42  ;;  %1627 = vmatpush.msra.mxu2 %v1604_v33  ;;  %v1601_v55 = vld [vmem:[%s2071_s1 + $0x10] sm:$0xff] }
 0x36c   : > { %1153 = vst.msk [vmem:[#allocation8 + $0x4] sm:$0x3] %vm998_vm3, %v1151_v61  ;;  %v1223_v3 = vadd.f32 %v1222_v54, %v1221_v49  ;;  %v1346_v25 = vmul.f32 %v1908_v16, %v1271_v9  ;;  %v1341_v26 = vperm.slane %v1339_v11, 0  ;;  %v1270_v30 = vmul.f32 %v1910_v23, %v2208_v19 }
 0x36d   : > { %v1474_v32 = vmul.f32 1.442695, %v1472_v14  ;;  %v1469_v34 = vperm.slane %v1467_v15, 0  ;;  %v1399_v39 = vmul.f32 1.442695, %v1396_v13  ;;  %1628 = vmatpush.msra.mxu2 %v1603_v44  ;;  %v1494_v5 = vperm.slane %v1463_v1, 0 }
 0x36e   : > { %v1224_v6 = vrot.slane %v1223_v3, 1  ;;  %v2237_v35 = vadd.f32 %v1346_v25, %v1344_v21  ;;  %v1272_v38 = vadd.f32 %v1270_v30, %v1268_v12  ;;  %v1345_v41 = vmul.f32 %v1341_v26, %v1337_v56 }
 0x36f   : > { %v1912_v40 = vpop.eup %1911  ;;  %1915 = vpow2.f32 %v1474_v32  ;;  %v1473_v49 = vmul.f32 %v1469_v34, %v2169_v57  ;;  %1629 = vmatpush.msra.mxu2 %v1602_v50  ;;  %v1416_v56 = vrot.slane %v2226_v10, 1  ;;  %v1600_v57 = vld [vmem:[%s2071_s1 + $0x8] sm:$0xff] }
 0x370   : > { %v1225_v18 = vadd.f32 %v1224_v6, %v1223_v3  ;;  %1917 = vpow2.f32 %v1399_v39  ;;  %v1423_v48 = vmul.f32 %v1912_v40, %v2237_v35 }
 0x371   : > { %v1914_v46 = vpop.eup %1913  ;;  %1630 = vmatpush.msra.mxu2 %v1601_v55  ;;  %v1476_v0 = vmul.f32 1.442695, %v1473_v49  ;;  %v1418_v10 = vperm.slane %v1416_v56, 0  ;;  %v1856_v56 = vld [vmem:[%s627_s14] ss:$0 sm:$0xff] }
 0x372   : > { %v1228_v24 = vsel %vm995_vm2, %v1225_v18, %v1218_v17  ;;  %v1484_v27 = vpop.permute.xlu1 %1483  ;;  %v1407_v28 = vpop.permute.xlu0 %1406  ;;  %v1347_v47 = vmul.f32 %v1914_v46, %v1272_v38 }
 0x373   : > { %1230 = vst.msk [vmem:[#allocation8 + $0x6] sm:$0x3] %vm998_vm3, %v1228_v24  ;;  %v1279_v29 = vpop.permute.xlu2 %1278  ;;  %v1421_v43 = vmul.f32 %v1417_v4, %v1407_v28  ;;  %1631 = vmatpush.msra.mxu2 %v1600_v57  ;;  %v1498_v15 = vmul.f32 %v1494_v5, %v1484_v27  ;;  %1919 = vpow2.f32 %v1476_v0  ;;  %v1422_v18 = vmul.f32 %v1418_v10, %v2222_v62 }
 0x374   : > { %v1287_v37 = vmul.f32 %v1279_v29, %v1271_v9  ;;  %v1349_v54 = vadd.f32 %v1347_v47, %v1345_v41  ;;  %v1493_v9 = vrot.slane %v1463_v1, 1 }
 0x375   : > { %v1425_v20 = vadd.f32 %v1423_v48, %v1421_v43  ;;  %v1916_v3 = vpop.eup %1915  ;;  %1632 = vmatpush.msra.mxu2 %v1599_v2 }
 0x376   : > { %v1289_v19 = vsel %vm751_vm9, %v1287_v37, 0.0  ;;  %v1918_v42 = vpop.eup %1917  ;;  %v1495_v22 = vperm.slane %v1493_v9, 0 }
 0x377   : > { %v1290_v45 = vrot.slane %v1289_v19, 4  ;;  %v1500_v11 = vmul.f32 %v1916_v3, %v1425_v20  ;;  %v1424_v14 = vmul.f32 %v1918_v42, %v1349_v54  ;;  %v1545_v42 = vmul.f32 %v1856_v56, %v2137_v51 }
 0x379   : > { %v1291_v52 = vadd.f32 %v1290_v45, %v1289_v19  ;;  %v1502_v4 = vadd.f32 %v1500_v11, %v1498_v15  ;;  %v1426_v31 = vadd.f32 %v1424_v14, %v1422_v18  ;;  %v1920_v37 = vpop.eup %1919 }
 0x37a   : > { %v1286_v53 = vpop.permute.xlu1 %1285  ;;  %v1491_v36 = vpop.permute.xlu0 %1490  ;;  %v1539_v3 = vld [vmem:[#allocation8] sm:$0xff] }
 0x37b   : > { %v1288_v58 = vmul.f32 %v1286_v53, %v1272_v38  ;;  %v1363_v59 = vpop.permute.xlu2 %1362  ;;  %v1292_v61 = vrot.slane %v1291_v52, 2  ;;  %v1499_v33 = vmul.f32 %v1495_v22, %v1491_v36  ;;  %v1501_v44 = vmul.f32 %v1920_v37, %v1426_v31 }
 0x37c   : > { %v1365_v63 = vmul.f32 %v1363_v59, %v1349_v54  ;;  %v1547_v10 = vadd.f32 %v1545_v42, %v1539_v3 }
 0x37d   : > { %v1296_v7 = vsel %vm751_vm9, %v1288_v58, 0.0  ;;  %v1293_v16 = vadd.f32 %v1292_v61, %v1291_v52  ;;  %v1503_v49 = vadd.f32 %v1501_v44, %v1499_v33  ;;  %v1922_v44 = vld [vmem:[#allocation2 + $0x8] sm:$0xff] }
 0x37e   : > { %v1297_v6 = vrot.slane %v1296_v7, 4  ;;  %v1373_v8 = vsel %vm751_vm9, %v1365_v63, 0.0 }
 0x37f   : > { %v1374_v13 = vrot.slane %v1373_v8, 4  ;;  %v1294_v29 = vrot.slane %v1293_v16, 1 }
 0x380   : > { %v1298_v17 = vadd.f32 %v1297_v6, %v1296_v7 }
 0x381   : > { %v1375_v12 = vadd.f32 %v1374_v13, %v1373_v8 }
 0x382   : > { %v1299_v21 = vrot.slane %v1298_v17, 2  ;;  %v1433_v23 = vpop.permute.xlu1 %1432  ;;  %v1356_v24 = vpop.permute.xlu0 %1355 }
 0x383   : > { %v1376_v25 = vrot.slane %v1375_v12, 2  ;;  %v1441_v26 = vmul.f32 %v1433_v23, %v1425_v20  ;;  %v1510_v28 = vpop.permute.xlu2 %1509  ;;  %v1364_v30 = vmul.f32 %v1356_v24, %v2237_v35  ;;  %v1295_v35 = vadd.f32 %v1294_v29, %v1293_v16 }
 0x384   : > { %v1300_v32 = vadd.f32 %v1299_v21, %v1298_v17  ;;  %v1518_v27 = vmul.f32 %v1510_v28, %v1502_v4 }
 0x385   : > { %v1443_v34 = vsel %vm751_vm9, %v1441_v26, 0.0  ;;  %v1366_v62 = vsel %vm751_vm9, %v1364_v30, 0.0  ;;  %v1377_v19 = vadd.f32 %v1376_v25, %v1375_v12 }
 0x386   : > { %v1301_v38 = vrot.slane %v1300_v32, 1  ;;  %v1444_v39 = vrot.slane %v1443_v34, 4  ;;  %v1520_v40 = vsel %vm751_vm9, %v1518_v27, 0.0  ;;  %v1367_v41 = vrot.slane %v1366_v62, 4 }
 0x387   : > { %v1521_v43 = vrot.slane %v1520_v40, 4  ;;  %v1378_v54 = vrot.slane %v1377_v19, 1 }
 0x388   : > { %v1302_v46 = vadd.f32 %v1301_v38, %v1300_v32  ;;  %v1445_v45 = vadd.f32 %v1444_v39, %v1443_v34  ;;  %v1368_v47 = vadd.f32 %v1367_v41, %v1366_v62  ;;  %v1857_v34 = vld [vmem:[%s635_s25] ss:$0 sm:$0xff] }
 0x389   : > { %v1522_v48 = vadd.f32 %v1521_v43, %v1520_v40  ;;  %v1379_v5 = vadd.f32 %v1378_v54, %v1377_v19  ;;  %v1858_v62 = vld [vmem:[%s638_s7] ss:$0 sm:$0xff] }
 0x38a   : > { %v1305_v50 = vsel %vm995_vm2, %v1302_v46, %v1295_v35  ;;  %v1369_v52 = vrot.slane %v1368_v47, 2  ;;  %v1517_v1 = vpop.permute.xlu1 %1516  ;;  %v1440_v53 = vpop.permute.xlu0 %1439  ;;  %v1446_v36 = vrot.slane %v1445_v45, 2 }
 0x38b   : > { %1307 = vst.msk [vmem:[#allocation8 + $0x8] sm:$0x3] %vm998_vm3, %v1305_v50  ;;  %v1519_v20 = vmul.f32 %v1517_v1, %v1503_v49  ;;  %v1442_v55 = vmul.f32 %v1440_v53, %v1426_v31  ;;  %v1523_v58 = vrot.slane %v1522_v48, 2  ;;  %v1546_v31 = vmul.f32 %v1856_v56, %v2141_v60  ;;  %v1594_v27 = vpop.permute.xlu2 %1593  ;;  %v1921_v60 = vld [vmem:[#allocation2] sm:$0xff] }
 0x38c   : > { %v1370_v59 = vadd.f32 %v1369_v52, %v1368_v47  ;;  %v1447_v7 = vadd.f32 %v1446_v36, %v1445_v45 }
 0x38d   : > { %v1527_v61 = vsel %vm751_vm9, %v1519_v20, 0.0  ;;  %v1450_v63 = vsel %vm751_vm9, %v1442_v55, 0.0  ;;  %v1524_v6 = vadd.f32 %v1523_v58, %v1522_v48 }
 0x38e   : > { %v1371_v0 = vrot.slane %v1370_v59, 1  ;;  %v1528_v57 = vrot.slane %v1527_v61, 4  ;;  %v1451_v2 = vrot.slane %v1450_v63, 4  ;;  %v1448_v18 = vrot.slane %v1447_v7, 1 }
 0x38f   : > { %v1525_v12 = vrot.slane %v1524_v6, 1 }
 0x390   : > { %v1372_v8 = vadd.f32 %v1371_v0, %v1370_v59  ;;  %v1529_v9 = vadd.f32 %v1528_v57, %v1527_v61  ;;  %v1452_v11 = vadd.f32 %v1451_v2, %v1450_v63  ;;  %v1449_v4 = vadd.f32 %v1448_v18, %v1447_v7 }
 0x391   : > { %v1526_v24 = vadd.f32 %v1525_v12, %v1524_v6 }
 0x392   : > { %v1382_v13 = vsel %vm995_vm2, %v1379_v5, %v1372_v8  ;;  %v1530_v14 = vrot.slane %v1529_v9, 2  ;;  %v1453_v15 = vrot.slane %v1452_v11, 2  ;;  %v1592_v16 = vpop.permute.xlu0 %1591 }
 0x393   : > { %1384 = vst.msk [vmem:[#allocation8 + $0xa] sm:$0x3] %vm998_vm3, %v1382_v13  ;;  %v1597_v17 = vmul.f32 %v1592_v16, %v1547_v10 }
 0x394   : > { %v1531_v21 = vadd.f32 %v1530_v14, %v1529_v9  ;;  %v1454_v22 = vadd.f32 %v1453_v15, %v1452_v11 }
 0x395   : > { %1821 = vmatmul.msk.f32.vlgmr.msra.gmra.mxu2 %vm751_vm9, %v1597_v17 }
 0x396   : > { %v1532_v51 = vrot.slane %v1531_v21, 1  ;;  %v1455_v23 = vrot.slane %v1454_v22, 1 }
 0x398   : > { %v1533_v25 = vadd.f32 %v1532_v51, %v1531_v21  ;;  %v1456_v26 = vadd.f32 %v1455_v23, %v1454_v22 }
 0x39a   : > { %v1536_v28 = vsel %vm995_vm2, %v1533_v25, %v1526_v24  ;;  %v1459_v30 = vsel %vm995_vm2, %v1456_v26, %v1449_v4 }
 0x39b   : > { %1538 = vst.msk [vmem:[#allocation8 + $0xe] sm:$0x3] %vm998_vm3, %v1536_v28 }
 0x39c   : > { %1461 = vst.msk [vmem:[#allocation8 + $0xc] sm:$0x3] %vm998_vm3, %v1459_v30 }
 0x3a3   : > { %v1540_v29 = vld [vmem:[#allocation8 + $0x8] sm:$0xff] }
 0x3a4   : > { %v1548_v32 = vadd.f32 %v1546_v31, %v1540_v29 }
 0x3a6   : > { %v1598_v33 = vmul.f32 %v1594_v27, %v1548_v32 }
 0x3a8   : > { %1822 = vmatmul.msk.f32.gmra.mxu2 %vm751_vm9, %v1598_v33 }
 0x418   : > { %v1634_v37 = vpop.f32.mrf.mxu2 }
 0x419   : > { %v1635_v38 = vadd.f32 %v1857_v34, %v1634_v37 }
 0x41b   : > { %v1644_v39 = vmul.f32 %v1858_v62, %v1635_v38 }
 0x41d   : > { %v1646_v40 = vadd.f32 %v1921_v60, %v1644_v39 }
 0x41f   : > { %1648 = vst.msk [vmem:[#allocation2] sm:$0xff] %vm650_vm1, %v1646_v40 }
 0x420   : > { %1650 = vst.msk [vmem:[%s2333_s2] sm:$0xff] %vm650_vm1, %v1646_v40 }
 0x42b   : > { %v1637_v41 = vpop.f32.mrf.mxu2 }
 0x42c   : > { %v1638_v19 = vadd.f32 %v1857_v34, %v1637_v41 }
 0x42e   : > { %v1645_v43 = vmul.f32 %v1858_v62, %v1638_v19 }
 0x430   : > { %v1647_v35 = vadd.f32 %v1922_v44, %v1645_v43 }
 0x432   : > { %1649 = vst.msk [vmem:[#allocation2 + $0x8] sm:$0xff] %vm650_vm1, %v1647_v35 }
 0x433   : > { %1651 = vst.msk [vmem:[%s2333_s2 + $0x8] sm:$0xff] %vm650_vm1, %v1647_v35 }
 0x434 PF: > { %s2334_s25 = sld [smem:[#allocation9_spill]] }
 0x43a   : > { %s24_s29 = sadd.s32 1, %s2334_s25  }
 0x43b   : > { %p21_p5 = scmp.ge.s32.totalorder %s24_s29, 4  }
 0x43d   :  { %23 = sbr.rel (!%p21_p5) target bundleno = 7 (0x7), region = 142 }

</bundles_post_ra>
